<compile_context>
chip_gen: v5e
topology: v5e:2x2
jax: 0.10.0
libtpu: 0.0.40
codegen_flags: <defaults>
</compile_context>

<pallas_src>
import jax
import jax.numpy as jnp
from jax import lax
from jax.experimental import pallas as pl
from jax.experimental.pallas import tpu as pltpu

# Match the reference matmul precision (pure-JAX `@` and the in-kernel dots).
jax.config.update("jax_default_matmul_precision", "highest")

# ----------------------------- model dimensions -----------------------------
B  = 8     # batch
L  = 32    # latent_dims (== cond_dims)
H  = 64    # hidden width of the synthetic encoder / decoder MLPs
DY = 64    # flattened observation dim (y_batch features)
DC = 16    # conditioning dim (c_batch features)

LANES = 128
N_STAGES = 8

# Lane layout of the packed input slab X = [noise | y | c | one | pad]
COL_N, COL_Y, COL_C, COL_ONE = 0, L, L + DY, L + DY + DC          # 0, 32, 96, 112
assert COL_ONE + 1 <= LANES and 2 * L + DY == LANES


# --------------------------------- kernel -----------------------------------
def cvae_kernel(x_ref, w_ref, out_ref):
    X = x_ref[...]                                                 # [TM, 128]
    lane = lax.broadcasted_iota(jnp.int32, X.shape, 1)

    def stage(act, k):
        # One uniform 128x128 MXU stage; bias rides on the "ones" lane (row COL_ONE).
        return jnp.dot(act, w_ref[k], preferred_element_type=jnp.float32,
                       precision=lax.Precision.HIGHEST)

    # ----- encode: four 128-wide block-diagonal stages -----
    s1 = stage(X, 0)                                   # [h_pre(64) | aux_enc(32) | c(16) | 1]
    a1 = jnp.where(lane < H, jnp.maximum(s1, 0.0), s1)          # ReLU only on encoder hidden
    s2 = stage(a1, 1)                                  # [enc(64)   | aux_enc(32) | c(16) | 1]
    s3 = stage(s2, 2)                                  # [pre1(32)  | aux_dec(32) | 1]
    a3 = jnp.where(lane < L, jnp.maximum(s3, 0.0), s3)          # ReLU only on pre1
    s4 = stage(a3, 3)                                  # [stds_pre(32) | means(32) | aux_dec(32) | 1]

    # ----- reparameterize (stable softplus; full-width, lanes >= L unused there) -----
    sp = jnp.maximum(s4, 0.0) + jnp.log(1.0 + jnp.exp(-jnp.abs(s4)))   # softplus(s4)
    # d_in = [stds*noise | means | aux_dec | 1]; stage-5 weight folds latent = means+stds*noise
    d_in = jnp.where(lane < L, sp * X, s4)

    # ----- decode: four more 128-wide stages, biases folded via the ones lane -----
    a5 = jnp.maximum(stage(d_in, 4), 0.0)              # [relu(pre2)(32) | 1]
    s6 = stage(a5, 5)                                  # [z_dec(32) | 1]
    a7 = jnp.maximum(stage(s6, 6), 0.0)                # [h_dec(64) | 1]
    s8 = stage(a7, 7)                                  # [0(64) | logits(64)]

    # ----- single unmasked full-width store: [stds(32) | means(32) | recon(64)] -----
    out_ref[...] = jnp.where(lane < L, sp, jnp.where(lane < 2 * L, s4, s8))


# ------------------------------ prep-time packing ----------------------------
def pack_inputs(y, c, noise, rows):
    b = y.shape[0]
    pad = jnp.zeros((b, LANES - (L + DY + DC + 1)), jnp.float32)
    x = jnp.concatenate([noise, y, c, jnp.ones((b, 1), jnp.float32), pad], axis=-1)
    if rows > b:
        x = jnp.concatenate([x, jnp.zeros((rows - b, LANES), jnp.float32)], axis=0)
    return x                                                       # [rows, 128]


def pack_weights(p):
    """Pack all 8 stages into one [8, 128, 128] f32 slab (called ONCE at setup)."""
    I16 = jnp.eye(DC, dtype=jnp.float32)
    I32 = jnp.eye(L, dtype=jnp.float32)
    W = jnp.zeros((N_STAGES, LANES, LANES), jnp.float32)
    one = COL_ONE

    # stage 0: X=[noise|y|c|1] -> [h_pre | aux_enc | c | 1]
    W = W.at[0, COL_Y:COL_Y + DY, 0:H].set(p["we1"])
    W = W.at[0, COL_C:COL_C + DC, H:H + L].set(p["wae"])
    W = W.at[0, COL_C:COL_C + DC, H + L:H + L + DC].set(I16)       # c passthrough
    W = W.at[0, one, 0:H].set(p["be1"][0])
    W = W.at[0, one, H:H + L].set(p["bae"][0])
    W = W.at[0, one, one].set(1.0)

    # stage 1: [h | aux_enc | c | 1] -> [enc | aux_enc | c | 1]
    W = W.at[1, 0:H, 0:2 * L].set(p["we2"])
    W = W.at[1, H:H + L, H:H + L].set(I32)                         # aux_enc passthrough
    W = W.at[1, H + L:H + L + DC, H + L:H + L + DC].set(I16)       # c passthrough
    W = W.at[1, one, 0:2 * L].set(p["be2"][0])
    W = W.at[1, one, one].set(1.0)

    # stage 2: [enc | aux_enc | c | 1] -> [pre1 | aux_dec | 1]
    W = W.at[2, 0:3 * L, 0:L].set(p["wb1"])
    W = W.at[2, COL_C:COL_C + DC, L:2 * L].set(p["wad"])           # aux_decoder from c
    W = W.at[2, one, 0:L].set(p["bb1"][0])
    W = W.at[2, one, L:2 * L].set(p["bad"][0])
    W = W.at[2, one, one].set(1.0)

    # stage 3: [relu(pre1) | aux_dec | 1] -> [stds_pre | means | aux_dec | 1]
    W = W.at[3, 0:L, 0:L].set(p["wb2"][:, L:2 * L])                # stds columns
    W = W.at[3, 0:L, L:2 * L].set(p["wb2"][:, 0:L])                # means columns
    W = W.at[3, L:2 * L, 2 * L:3 * L].set(I32)                     # aux_dec passthrough
    W = W.at[3, one, 0:L].set(p["bb2"][0, L:2 * L])
    W = W.at[3, one, L:2 * L].set(p["bb2"][0, 0:L])
    W = W.at[3, one, one].set(1.0)

    # stage 4 (after_z L1, reparam fused): [stds*noise | means | aux_dec | 1] -> [pre2 | 1]
    W = W.at[4, 0:L, 0:L].set(p["wa1"][0:L])                       # latent rows (stds*noise)
    W = W.at[4, L:2 * L, 0:L].set(p["wa1"][0:L])                   # latent rows (means)
    W = W.at[4, 2 * L:3 * L, 0:L].set(p["wa1"][L:2 * L])           # aux_dec rows
    W = W.at[4, one, 0:L].set(p["ba1"][0])
    W = W.at[4, one, one].set(1.0)

    # stage 5 (after_z L2): [relu(pre2) | 1] -> [z_dec | 1]
    W = W.at[5, 0:L, 0:L].set(p["wa2"])
    W = W.at[5, one, 0:L].set(p["ba2"][0])
    W = W.at[5, one, one].set(1.0)

    # stage 6 (decoder L1): [z_dec | 1] -> [h_dec_pre | 1]
    W = W.at[6, 0:L, 0:H].set(p["wd1"])
    W = W.at[6, one, 0:H].set(p["bd1"][0])
    W = W.at[6, one, one].set(1.0)

    # stage 7 (decoder L2): [relu(h_dec) | 1] -> [0(64) | logits(64)]
    W = W.at[7, 0:H, DY:2 * DY].set(p["wd2"])
    W = W.at[7, one, DY:2 * DY].set(p["bd2"][0])
    return W


# --------------------------------- wrapper -----------------------------------
def _row_tiling(b):
    bp = ((max(b, 1) + 7) // 8) * 8
    tm = 256 if bp > 256 else bp
    bp = ((bp + tm - 1) // tm) * tm
    return bp, tm


@jax.jit
def cvae_forward(y, c, noise, w_slab):
    b = y.shape[0]
    bp, tm = _row_tiling(b)
    x_slab = pack_inputs(y, c, noise, bp)

    flops = 2 * bp * LANES * LANES * N_STAGES
    bytes_accessed = 4 * (2 * bp * LANES + N_STAGES * LANES * LANES)

    out = pl.pallas_call(
        cvae_kernel,
        out_shape=jax.ShapeDtypeStruct((bp, LANES), jnp.float32),
        grid_spec=pltpu.PrefetchScalarGridSpec(
            num_scalar_prefetch=0,
            grid=(bp // tm,),
            in_specs=[
                pl.BlockSpec((tm, LANES), lambda i: (i, 0)),
                pl.BlockSpec((N_STAGES, LANES, LANES), lambda i: (0, 0, 0)),  # resident
            ],
            out_specs=pl.BlockSpec((tm, LANES), lambda i: (i, 0)),
        ),
        compiler_params=pltpu.CompilerParams(dimension_semantics=("parallel",)),
        cost_estimate=pl.CostEstimate(flops=flops, transcendentals=bp * LANES,
                                      bytes_accessed=bytes_accessed),
    )(x_slab, w_slab)

    stds = out[:b, 0:L]
    means = out[:b, L:2 * L]
    recon = out[:b, 2 * L:2 * L + DY]
    return means, stds, recon


# ----------------------------- reference (pure JAX) ---------------------------
def cvae_reference(y, c, noise, p):
    aux_enc = c @ p["wae"] + p["bae"]
    h = jax.nn.relu(y @ p["we1"] + p["be1"])
    enc = h @ p["we2"] + p["be2"]
    before = jnp.concatenate([enc, aux_enc], axis=-1)
    zb = jax.nn.relu(before @ p["wb1"] + p["bb1"]) @ p["wb2"] + p["bb2"]
    means = zb[:, :L]
    stds = jax.nn.softplus(zb[:, L:])
    latent = means + stds * noise
    aux_dec = c @ p["wad"] + p["bad"]
    after = jnp.concatenate([latent, aux_dec], axis=-1)
    zd = jax.nn.relu(after @ p["wa1"] + p["ba1"]) @ p["wa2"] + p["ba2"]
    hd = jax.nn.relu(zd @ p["wd1"] + p["bd1"])
    logits = hd @ p["wd2"] + p["bd2"]
    return means, stds, logits


def init_params(key):
    """Deterministic synthetic parameter init (weights stored as [in, out])."""
    shapes = {
        "wae": (DC, L), "bae": (1, L),                    # aux_encoder: Linear(DC -> L)
        "we1": (DY, H), "be1": (1, H),                    # encoder: Linear(DY -> H), ReLU,
        "we2": (H, 2 * L), "be2": (1, 2 * L),             #          Linear(H -> 2L)
        "wb1": (3 * L, L), "bb1": (1, L),                 # before_z: Linear(3L -> L), ReLU,
        "wb2": (L, 2 * L), "bb2": (1, 2 * L),             #           Linear(L -> 2L)
        "wad": (DC, L), "bad": (1, L),                    # aux_decoder: Linear(DC -> L)
        "wa1": (2 * L, L), "ba1": (1, L),                 # after_z: Linear(2L -> L), ReLU,
        "wa2": (L, L), "ba2": (1, L),                     #          Linear(L -> L)
        "wd1": (L, H), "bd1": (1, H),                     # decoder: Linear(L -> H), ReLU,
        "wd2": (H, DY), "bd2": (1, DY),                   #          Linear(H -> DY)
    }
    params = {}
    keys = jax.random.split(key, len(shapes))
    for k_rng, (name, shp) in zip(keys, sorted(shapes.items())):
        scale = 0.1 if name.startswith("w") else 0.01
        params[name] = scale * jax.random.normal(k_rng, shp, dtype=jnp.float32)
    return params


if __name__ == "__main__":
    root = jax.random.PRNGKey(0)
    k_y, k_c, k_noise, k_p = jax.random.split(root, 4)

    y_batch = jax.random.normal(k_y, (B, DY), dtype=jnp.float32)
    c_batch = jax.random.normal(k_c, (B, DC), dtype=jnp.float32)
    # torch.randn_like(means) -> sampled here in JAX and passed into the kernel
    noise = jax.random.normal(k_noise, (B, L), dtype=jnp.float32)

    params = init_params(k_p)
    w_slab = jax.block_until_ready(pack_weights(params))   # packed ONCE, off the hot path

    means, stds, recon = jax.block_until_ready(
        cvae_forward(y_batch, c_batch, noise, w_slab))

    means_r, stds_r, recon_r = cvae_reference(y_batch, c_batch, noise, params)
    assert means.shape == (B, L) and stds.shape == (B, L) and recon.shape == (B, DY)
    assert jnp.allclose(means, means_r, atol=1e-4, rtol=1e-4)
    assert jnp.allclose(stds, stds_r, atol=1e-4, rtol=1e-4)
    assert jnp.allclose(recon, recon_r, atol=1e-4, rtol=1e-4)

    print("KERNEL_OK")
</pallas_src>

<mosaic_0001>
module attributes {stable_mosaic.version = 11 : i64} {
  func.func @cvae_kernel(%arg0: i32, %arg1: memref<8x128xf32, #tpu.memory_space<vmem>>, %arg2: memref<8x128x128xf32, #tpu.memory_space<vmem>>, %arg3: memref<8x128xf32, #tpu.memory_space<vmem>>) attributes {dimension_semantics = [#tpu.dimension_semantics<parallel>], iteration_bounds = array<i64: 1>, scalar_prefetch = 0 : i64, scratch_operands = 0 : i64, tpu.core_type = #tpu.core_type<tc>, window_params = [{transform_indices = @transform_0, window_bounds = array<i64: 8, 128>}, {pipeline_mode = #tpu.pipeline_mode<synchronous>, transform_indices = @transform_1, window_bounds = array<i64: 8, 128, 128>}, {transform_indices = @transform_2, window_bounds = array<i64: 8, 128>}]} {
    %c0 = arith.constant 0 : index
    %c0_0 = arith.constant 0 : index
    %0 = vector.load %arg1[%c0, %c0_0] : memref<8x128xf32, #tpu.memory_space<vmem>>, vector<8x128xf32>
    %1 = tpu.iota {dimensions = array<i32: 1>} : vector<8x128xi32>
    %c0_1 = arith.constant 0 : index
    %c0_2 = arith.constant 0 : index
    %c0_3 = arith.constant 0 : index
    %2 = vector.load %arg2[%c0_1, %c0_2, %c0_3] : memref<8x128x128xf32, #tpu.memory_space<vmem>>, vector<1x128x128xf32>
    %3 = vector.shape_cast %2 : vector<1x128x128xf32> to vector<128x128xf32>
    %cst = arith.constant dense<0.000000e+00> : vector<8x128xf32>
    %4 = tpu.matmul %0, %3, %cst {dimension_numbers = #tpu.dot_dimension_numbers<[1], [0], [0], [1], [0, 0, 1, 1], [], []>, precision = #tpu.contract_precision<fp32>} : vector<8x128xf32>, vector<128x128xf32>, vector<8x128xf32> -> vector<8x128xf32>
    %c64_i32 = arith.constant 64 : i32
    %5 = vector.broadcast %c64_i32 : i32 to vector<8x128xi32>
    %6 = arith.cmpi slt, %1, %5 : vector<8x128xi32>
    %cst_4 = arith.constant 0.000000e+00 : f32
    %7 = vector.broadcast %cst_4 : f32 to vector<8x128xf32>
    %8 = arith.maximumf %4, %7 : vector<8x128xf32>
    %9 = arith.select %6, %8, %4 : vector<8x128xi1>, vector<8x128xf32>
    %c1 = arith.constant 1 : index
    %c0_5 = arith.constant 0 : index
    %c0_6 = arith.constant 0 : index
    %10 = vector.load %arg2[%c1, %c0_5, %c0_6] : memref<8x128x128xf32, #tpu.memory_space<vmem>>, vector<1x128x128xf32>
    %11 = vector.shape_cast %10 : vector<1x128x128xf32> to vector<128x128xf32>
    %cst_7 = arith.constant dense<0.000000e+00> : vector<8x128xf32>
    %12 = tpu.matmul %9, %11, %cst_7 {dimension_numbers = #tpu.dot_dimension_numbers<[1], [0], [0], [1], [0, 0, 1, 1], [], []>, precision = #tpu.contract_precision<fp32>} : vector<8x128xf32>, vector<128x128xf32>, vector<8x128xf32> -> vector<8x128xf32>
    %c2 = arith.constant 2 : index
    %c0_8 = arith.constant 0 : index
    %c0_9 = arith.constant 0 : index
    %13 = vector.load %arg2[%c2, %c0_8, %c0_9] : memref<8x128x128xf32, #tpu.memory_space<vmem>>, vector<1x128x128xf32>
    %14 = vector.shape_cast %13 : vector<1x128x128xf32> to vector<128x128xf32>
    %cst_10 = arith.constant dense<0.000000e+00> : vector<8x128xf32>
    %15 = tpu.matmul %12, %14, %cst_10 {dimension_numbers = #tpu.dot_dimension_numbers<[1], [0], [0], [1], [0, 0, 1, 1], [], []>, precision = #tpu.contract_precision<fp32>} : vector<8x128xf32>, vector<128x128xf32>, vector<8x128xf32> -> vector<8x128xf32>
    %c32_i32 = arith.constant 32 : i32
    %16 = vector.broadcast %c32_i32 : i32 to vector<8x128xi32>
    %17 = arith.cmpi slt, %1, %16 : vector<8x128xi32>
    %cst_11 = arith.constant 0.000000e+00 : f32
    %18 = vector.broadcast %cst_11 : f32 to vector<8x128xf32>
    %19 = arith.maximumf %15, %18 : vector<8x128xf32>
    %20 = arith.select %17, %19, %15 : vector<8x128xi1>, vector<8x128xf32>
    %c3 = arith.constant 3 : index
    %c0_12 = arith.constant 0 : index
    %c0_13 = arith.constant 0 : index
    %21 = vector.load %arg2[%c3, %c0_12, %c0_13] : memref<8x128x128xf32, #tpu.memory_space<vmem>>, vector<1x128x128xf32>
    %22 = vector.shape_cast %21 : vector<1x128x128xf32> to vector<128x128xf32>
    %cst_14 = arith.constant dense<0.000000e+00> : vector<8x128xf32>
    %23 = tpu.matmul %20, %22, %cst_14 {dimension_numbers = #tpu.dot_dimension_numbers<[1], [0], [0], [1], [0, 0, 1, 1], [], []>, precision = #tpu.contract_precision<fp32>} : vector<8x128xf32>, vector<128x128xf32>, vector<8x128xf32> -> vector<8x128xf32>
    %cst_15 = arith.constant 0.000000e+00 : f32
    %24 = vector.broadcast %cst_15 : f32 to vector<8x128xf32>
    %25 = arith.maximumf %23, %24 : vector<8x128xf32>
    %26 = math.absf %23 : vector<8x128xf32>
    %cst_16 = arith.constant 0.000000e+00 : f32
    %27 = vector.broadcast %cst_16 : f32 to vector<8x128xf32>
    %28 = arith.subf %27, %26 : vector<8x128xf32>
    %29 = math.exp %28 : vector<8x128xf32>
    %cst_17 = arith.constant 1.000000e+00 : f32
    %30 = vector.broadcast %cst_17 : f32 to vector<8x128xf32>
    %31 = arith.addf %30, %29 : vector<8x128xf32>
    %32 = math.log %31 : vector<8x128xf32>
    %33 = arith.addf %25, %32 : vector<8x128xf32>
    %c32_i32_18 = arith.constant 32 : i32
    %34 = vector.broadcast %c32_i32_18 : i32 to vector<8x128xi32>
    %35 = arith.cmpi slt, %1, %34 : vector<8x128xi32>
    %36 = arith.mulf %33, %0 : vector<8x128xf32>
    %37 = arith.select %35, %36, %23 : vector<8x128xi1>, vector<8x128xf32>
    %c4 = arith.constant 4 : index
    %c0_19 = arith.constant 0 : index
    %c0_20 = arith.constant 0 : index
    %38 = vector.load %arg2[%c4, %c0_19, %c0_20] : memref<8x128x128xf32, #tpu.memory_space<vmem>>, vector<1x128x128xf32>
    %39 = vector.shape_cast %38 : vector<1x128x128xf32> to vector<128x128xf32>
    %cst_21 = arith.constant dense<0.000000e+00> : vector<8x128xf32>
    %40 = tpu.matmul %37, %39, %cst_21 {dimension_numbers = #tpu.dot_dimension_numbers<[1], [0], [0], [1], [0, 0, 1, 1], [], []>, precision = #tpu.contract_precision<fp32>} : vector<8x128xf32>, vector<128x128xf32>, vector<8x128xf32> -> vector<8x128xf32>
    %cst_22 = arith.constant 0.000000e+00 : f32
    %41 = vector.broadcast %cst_22 : f32 to vector<8x128xf32>
    %42 = arith.maximumf %40, %41 : vector<8x128xf32>
    %c5 = arith.constant 5 : index
    %c0_23 = arith.constant 0 : index
    %c0_24 = arith.constant 0 : index
    %43 = vector.load %arg2[%c5, %c0_23, %c0_24] : memref<8x128x128xf32, #tpu.memory_space<vmem>>, vector<1x128x128xf32>
    %44 = vector.shape_cast %43 : vector<1x128x128xf32> to vector<128x128xf32>
    %cst_25 = arith.constant dense<0.000000e+00> : vector<8x128xf32>
    %45 = tpu.matmul %42, %44, %cst_25 {dimension_numbers = #tpu.dot_dimension_numbers<[1], [0], [0], [1], [0, 0, 1, 1], [], []>, precision = #tpu.contract_precision<fp32>} : vector<8x128xf32>, vector<128x128xf32>, vector<8x128xf32> -> vector<8x128xf32>
    %c6 = arith.constant 6 : index
    %c0_26 = arith.constant 0 : index
    %c0_27 = arith.constant 0 : index
    %46 = vector.load %arg2[%c6, %c0_26, %c0_27] : memref<8x128x128xf32, #tpu.memory_space<vmem>>, vector<1x128x128xf32>
    %47 = vector.shape_cast %46 : vector<1x128x128xf32> to vector<128x128xf32>
    %cst_28 = arith.constant dense<0.000000e+00> : vector<8x128xf32>
    %48 = tpu.matmul %45, %47, %cst_28 {dimension_numbers = #tpu.dot_dimension_numbers<[1], [0], [0], [1], [0, 0, 1, 1], [], []>, precision = #tpu.contract_precision<fp32>} : vector<8x128xf32>, vector<128x128xf32>, vector<8x128xf32> -> vector<8x128xf32>
    %cst_29 = arith.constant 0.000000e+00 : f32
    %49 = vector.broadcast %cst_29 : f32 to vector<8x128xf32>
    %50 = arith.maximumf %48, %49 : vector<8x128xf32>
    %c7 = arith.constant 7 : index
    %c0_30 = arith.constant 0 : index
    %c0_31 = arith.constant 0 : index
    %51 = vector.load %arg2[%c7, %c0_30, %c0_31] : memref<8x128x128xf32, #tpu.memory_space<vmem>>, vector<1x128x128xf32>
    %52 = vector.shape_cast %51 : vector<1x128x128xf32> to vector<128x128xf32>
    %cst_32 = arith.constant dense<0.000000e+00> : vector<8x128xf32>
    %53 = tpu.matmul %50, %52, %cst_32 {dimension_numbers = #tpu.dot_dimension_numbers<[1], [0], [0], [1], [0, 0, 1, 1], [], []>, precision = #tpu.contract_precision<fp32>} : vector<8x128xf32>, vector<128x128xf32>, vector<8x128xf32> -> vector<8x128xf32>
    %c32_i32_33 = arith.constant 32 : i32
    %54 = vector.broadcast %c32_i32_33 : i32 to vector<8x128xi32>
    %55 = arith.cmpi slt, %1, %54 : vector<8x128xi32>
    %c64_i32_34 = arith.constant 64 : i32
    %56 = vector.broadcast %c64_i32_34 : i32 to vector<8x128xi32>
    %57 = arith.cmpi slt, %1, %56 : vector<8x128xi32>
    %58 = arith.select %57, %23, %53 : vector<8x128xi1>, vector<8x128xf32>
    %59 = arith.select %55, %33, %58 : vector<8x128xi1>, vector<8x128xf32>
    %c0_35 = arith.constant 0 : index
    %c0_36 = arith.constant 0 : index
    %60 = vector.load %arg3[%c0_35, %c0_36] : memref<8x128xf32, #tpu.memory_space<vmem>>, vector<8x128xf32>
    tpu.vector_store %arg3[%c0_35, %c0_36], %59 {strides = array<i32>} : memref<8x128xf32, #tpu.memory_space<vmem>>, vector<8x128xf32>,
    return
  }
  func.func @transform_0(%arg0: i32) -> (i32, i32) {
    %c0_i32 = arith.constant 0 : i32
    %c0_i32_0 = arith.constant 0 : i32
    return %arg0, %c0_i32 : i32, i32
  }
  func.func @transform_1(%arg0: i32) -> (i32, i32, i32) {
    %c0_i32 = arith.constant 0 : i32
    %c0_i32_0 = arith.constant 0 : i32
    %c0_i32_1 = arith.constant 0 : i32
    %c0_i32_2 = arith.constant 0 : i32
    return %c0_i32, %c0_i32_0, %c0_i32_1 : i32, i32, i32
  }
  func.func @transform_2(%arg0: i32) -> (i32, i32) {
    %c0_i32 = arith.constant 0 : i32
    %c0_i32_0 = arith.constant 0 : i32
    return %arg0, %c0_i32 : i32, i32
  }
}

</mosaic_0001>

<bundles_post_ra>
// kernel: cvae_forward.1
= control target key start
LH: loop header
LB: loop body
LE: loop exit
PB: predicated region body
PF: predicated region fallthrough
CT: control target
= control target key end

     0   :  { %7 = vsyncpa [#allocation3], 0  ;;  %s2954_s12 = smov [#allocation2]   ;;  %s2955_s14 = smov 128   ;;  %s4822_s0 = inlined_call_operand.vmem [shape: f32[8,128], index: 0, kind: input, shape index: {}]   ;;  %s4823_s1 = inlined_call_operand.hbm [shape: f32[8,128,128], index: 1, kind: input, shape index: {}]   ;;  %s4824_s2 = inlined_call_operand.vmem [shape: f32[8,128], index: 2, kind: output, shape index: {}]  }
   0x1   :  { %s14_s11 = sshll.u32 %s4823_s1, 4  ;;  %s16_s13 = sshll.u32 %s2954_s12, 4  ;;  %s15_s11 = int_to_ptr.hbm [resolvable:$true] %s14_s11  ;;  %s17_s13 = int_to_ptr.vmem [resolvable:$true] %s16_s13 }
   0x2   :  { %s2956_s15 = smov 8  }
   0x3   :  { %22 = dma.hbm_to_vmem [thread:$0]  %s15_s11, 16384, %s17_s13, [#allocation3], %s2955_s14, %s2955_s14, %s2956_s15  }
   0x4   :  { %2952 = dma.done.wait [#allocation3], 16384  }
   0x5   :  { %2953 = vsyncadd [#allocation3], 4294950912  ;;  %v45_v0 = vld [vmem:[#allocation2 + $0x78] sm:$0xff]  ;;  %v44_v1 = vld [vmem:[#allocation2 + $0x70] sm:$0xff] }
   0x6   :  { %v43_v2 = vld [vmem:[#allocation2 + $0x68] sm:$0xff]  ;;  %v2975_v3 = vand.u32 4294901760, %v45_v0  ;;  %v2977_v4 = vand.u32 4294901760, %v44_v1  ;;  %v42_v6 = vld [vmem:[#allocation2 + $0x60] sm:$0xff]  ;;  %v41_v7 = vld [vmem:[#allocation2 + $0x58] sm:$0xff] }
   0x7   :  { %v2979_v5 = vand.u32 4294901760, %v43_v2  ;;  %v40_v8 = vld [vmem:[#allocation2 + $0x50] sm:$0xff]  ;;  %v2981_v9 = vand.u32 4294901760, %v42_v6  ;;  %v2983_v10 = vand.u32 4294901760, %v41_v7  ;;  %v39_v12 = vld [vmem:[#allocation2 + $0x48] sm:$0xff]  ;;  %v38_v13 = vld [vmem:[#allocation2 + $0x40] sm:$0xff] }
   0x8   :  { %v2985_v11 = vand.u32 4294901760, %v40_v8  ;;  %47 = vmatpush.msra.mxu0 %v2975_v3  ;;  %v2989_v14 = vsub.f32 %v45_v0, %v2975_v3  ;;  %v2992_v15 = vsub.f32 %v44_v1, %v2977_v4  ;;  %v2997_v17 = vand.u32 4294901760, %v39_v12  ;;  %v37_v18 = vld [vmem:[#allocation2 + $0x38] sm:$0xff]  ;;  %243 = vmatpush.msra.mxu3 %v2975_v3  ;;  %v36_v26 = vld [vmem:[#allocation2 + $0x30] sm:$0xff]  ;;  %v35_v36 = vld [vmem:[#allocation2 + $0x28] sm:$0xff] }
   0x9   :  { %v2995_v16 = vsub.f32 %v43_v2, %v2979_v5  ;;  %v3001_v19 = vsub.f32 %v42_v6, %v2981_v9  ;;  %v3004_v20 = vsub.f32 %v41_v7, %v2983_v10  ;;  %v3013_v25 = vand.u32 4294901760, %v38_v13  ;;  %v34_v42 = vld [vmem:[#allocation2 + $0x20] sm:$0xff]  ;;  %v33_v47 = vld [vmem:[#allocation2 + $0x18] sm:$0xff]  ;;  %v32_v55 = vld [vmem:[#allocation2 + $0x10] sm:$0xff] }
   0xa   :  { %v3007_v21 = vsub.f32 %v40_v8, %v2985_v11  ;;  %49 = vmatpush.msra.mxu0 %v2977_v4  ;;  %v89_v22 = vand.u32 4294901760, %v2989_v14  ;;  %v95_v23 = vand.u32 4294901760, %v2992_v15  ;;  %190 = vmatpush.msra.mxu2 %v2989_v14  ;;  %v3017_v28 = vand.u32 4294901760, %v37_v18  ;;  %v31_v60 = vld [vmem:[#allocation2 + $0x8] sm:$0xff]  ;;  %v30_v1 = vld [vmem:[#allocation2] sm:$0xff] }
   0xb   :  { %v101_v24 = vand.u32 4294901760, %v2995_v16  ;;  %v107_v27 = vand.u32 4294901760, %v3001_v19  ;;  %v3020_v29 = vsub.f32 %v39_v12, %v2997_v17  ;;  %245 = vmatpush.msra.mxu3 %v2977_v4  ;;  %v113_v33 = vand.u32 4294901760, %v3004_v20  ;;  %v27_v7 = vld [vmem:[%s4822_s0] sm:$0xff] }
   0xc   :  { %51 = vmatpush.msra.mxu0 %v2979_v5  ;;  %v90_v30 = vsub.f32 %v2989_v14, %v89_v22  ;;  %v96_v31 = vsub.f32 %v2992_v15, %v95_v23  ;;  %193 = vmatpush.msra.mxu2 %v2992_v15  ;;  %v119_v34 = vand.u32 4294901760, %v3007_v21  ;;  %v3036_v35 = vand.u32 4294901760, %v36_v26  ;;  %v406_v14 = vld [vmem:[#allocation2 + $0xf8] sm:$0xff] }
   0xd   :  { %v102_v32 = vsub.f32 %v2995_v16, %v101_v24  ;;  %247 = vmatpush.msra.mxu3 %v2979_v5  ;;  %v108_v39 = vsub.f32 %v3001_v19, %v107_v27  ;;  %v3044_v40 = vsub.f32 %v38_v13, %v3013_v25  ;;  %v125_v41 = vand.u32 4294901760, %v3020_v29 }
   0xe   :  { %v91_v37 = vand.u32 4294901760, %v90_v30  ;;  %53 = vmatpush.msra.mxu0 %v2981_v9  ;;  %v97_v38 = vand.u32 4294901760, %v96_v31  ;;  %196 = vmatpush.msra.mxu2 %v2995_v16  ;;  %v114_v44 = vsub.f32 %v3004_v20, %v113_v33  ;;  %v3053_v45 = vand.u32 4294901760, %v35_v36 }
   0xf   :  { %249 = vmatpush.msra.mxu3 %v2981_v9  ;;  %v103_v43 = vand.u32 4294901760, %v102_v32  ;;  %v3056_v46 = vsub.f32 %v37_v18, %v3017_v28  ;;  %v120_v48 = vsub.f32 %v3007_v21, %v119_v34  ;;  %v109_v49 = vand.u32 4294901760, %v108_v39 }
  0x10   :  { %92 = vmatpush.msra.mxu1 %v91_v37  ;;  %55 = vmatpush.msra.mxu0 %v2983_v10  ;;  %v131_v50 = vand.u32 4294901760, %v3044_v40  ;;  %v3065_v51 = vand.u32 4294901760, %v34_v42  ;;  %v3068_v52 = vsub.f32 %v36_v26, %v3036_v35  ;;  %v126_v53 = vsub.f32 %v3020_v29, %v125_v41 }
  0x11   :  { %199 = vmatpush.msra.mxu2 %v3001_v19  ;;  %251 = vmatpush.msra.mxu3 %v2983_v10  ;;  %v3073_v54 = vand.u32 4294901760, %v33_v47  ;;  %v115_v56 = vand.u32 4294901760, %v114_v44  ;;  %v137_v57 = vand.u32 4294901760, %v3056_v46  ;;  %v3080_v58 = vsub.f32 %v35_v36, %v3053_v45 }
  0x12   :  { %98 = vmatpush.msra.mxu1 %v97_v38  ;;  %57 = vmatpush.msra.mxu0 %v2985_v11  ;;  %v121_v59 = vand.u32 4294901760, %v120_v48  ;;  %v132_v61 = vsub.f32 %v3044_v40, %v131_v50  ;;  %v143_v62 = vand.u32 4294901760, %v3068_v52  ;;  %v3089_v63 = vand.u32 4294901760, %v32_v55 }
  0x13   :  { %202 = vmatpush.msra.mxu2 %v3004_v20  ;;  %253 = vmatpush.msra.mxu3 %v2985_v11  ;;  %v3092_v0 = vsub.f32 %v34_v42, %v3065_v51  ;;  %v127_v2 = vand.u32 4294901760, %v126_v53  ;;  %v3095_v6 = vsub.f32 %v33_v47, %v3073_v54  ;;  %v138_v8 = vsub.f32 %v3056_v46, %v137_v57  ;;  %v399_v20 = vld [vmem:[#allocation2 + $0xc0] sm:$0xff] }
  0x14   :  { %104 = vmatpush.msra.mxu1 %v103_v43  ;;  %59 = vmatpush.msra.mxu0 %v2997_v17  ;;  %v149_v12 = vand.u32 4294901760, %v3080_v58  ;;  %v3107_v13 = vand.u32 4294901760, %v31_v60  ;;  %v3109_v18 = vand.u32 4294901760, %v27_v7  ;;  %v3111_v26 = vand.u32 4294901760, %v30_v1 }
  0x15   :  { %205 = vmatpush.msra.mxu2 %v3007_v21  ;;  %255 = vmatpush.msra.mxu3 %v2997_v17  ;;  %v133_v30 = vand.u32 4294901760, %v132_v61  ;;  %v144_v31 = vsub.f32 %v3068_v52, %v143_v62  ;;  %v155_v32 = vand.u32 4294901760, %v3092_v0  ;;  %v3121_v36 = vsub.f32 %v32_v55, %v3089_v63 }
  0x16   :  { %110 = vmatpush.msra.mxu1 %v109_v49  ;;  %61 = vmatpush.msra.mxu0 %v3013_v25  ;;  %v161_v37 = vand.u32 4294901760, %v3095_v6  ;;  %v139_v38 = vand.u32 4294901760, %v138_v8  ;;  %v150_v39 = vsub.f32 %v3080_v58, %v149_v12  ;;  %v3131_v42 = vsub.f32 %v31_v60, %v3107_v13 }
  0x17   :  { %208 = vmatpush.msra.mxu2 %v3020_v29  ;;  %257 = vmatpush.msra.mxu3 %v3013_v25  ;;  %v79_v43 = vsub.f32 %v27_v7, %v3109_v18  ;;  %v145_v44 = vand.u32 4294901760, %v144_v31  ;;  %v156_v47 = vsub.f32 %v3092_v0, %v155_v32  ;;  %v167_v48 = vand.u32 4294901760, %v3121_v36 }
  0x18   :  { %116 = vmatpush.msra.mxu1 %v115_v56  ;;  %63 = vmatpush.msra.mxu0 %v3017_v28  ;;  %v3142_v49 = vsub.f32 %v30_v1, %v3111_v26  ;;  %v151_v53 = vand.u32 4294901760, %v150_v39  ;;  %v162_v55 = vsub.f32 %v3095_v6, %v161_v37  ;;  %v173_v56 = vand.u32 4294901760, %v3131_v42 }
  0x19   :  { %211 = vmatpush.msra.mxu2 %v3044_v40  ;;  %259 = vmatpush.msra.mxu3 %v3017_v28  ;;  %v157_v60 = vand.u32 4294901760, %v156_v47  ;;  %v168_v61 = vsub.f32 %v3121_v36, %v167_v48  ;;  %v404_v47 = vld [vmem:[#allocation2 + $0xe8] sm:$0xff]  ;;  %v3184_v15 = vand.u32 4294901760, %v406_v14  ;;  %v398_v40 = vld [vmem:[#allocation2 + $0xb8] sm:$0xff] }
  0x1a   :  { %122 = vmatpush.msra.mxu1 %v121_v59  ;;  %65 = vmatpush.msra.mxu0 %v3036_v35  ;;  %v80_v59 = vand.u32 4294901760, %v79_v43  ;;  %v179_v1 = vand.u32 4294901760, %v3142_v49  ;;  %v174_v7 = vsub.f32 %v3131_v42, %v173_v56  ;;  %v3188_v16 = vand.u32 4294901760, %v404_v47 }
  0x1b   :  { %214 = vmatpush.msra.mxu2 %v3056_v46  ;;  %261 = vmatpush.msra.mxu3 %v3036_v35  ;;  %v3263_v46 = vand.u32 4294901760, %v398_v40 }
  0x1c   :  { %128 = vmatpush.msra.mxu1 %v127_v2  ;;  %67 = vmatpush.msra.mxu0 %v3053_v45  ;;  %v163_v2 = vand.u32 4294901760, %v162_v55  ;;  %v81_v8 = vsub.f32 %v79_v43, %v80_v59  ;;  %v180_v31 = vsub.f32 %v3142_v49, %v179_v1 }
  0x1d   :  { %217 = vmatpush.msra.mxu2 %v3068_v52  ;;  %263 = vmatpush.msra.mxu3 %v3053_v45  ;;  %v3278_v52 = vsub.f32 %v398_v40, %v3263_v46 }
  0x1e   :  { %134 = vmatpush.msra.mxu1 %v133_v30  ;;  %69 = vmatpush.msra.mxu0 %v3065_v51  ;;  %v169_v30 = vand.u32 4294901760, %v168_v61  ;;  %v82_v39 = vand.u32 4294901760, %v81_v8  ;;  %v3224_v8 = vand.u32 4294901760, %v399_v20 }
  0x1f   :  { %220 = vmatpush.msra.mxu2 %v3080_v58  ;;  %265 = vmatpush.msra.mxu3 %v3065_v51 }
  0x20   :  { %140 = vmatpush.msra.mxu1 %v139_v38  ;;  %71 = vmatpush.msra.mxu0 %v3073_v54  ;;  %v175_v38 = vand.u32 4294901760, %v174_v7 }
  0x21   :  { %223 = vmatpush.msra.mxu2 %v3092_v0  ;;  %267 = vmatpush.msra.mxu3 %v3073_v54  ;;  %v392_v0 = vld [vmem:[#allocation2 + $0x88] sm:$0xff] }
  0x22   :  { %146 = vmatpush.msra.mxu1 %v145_v44  ;;  %73 = vmatpush.msra.mxu0 %v3089_v63  ;;  %v181_v44 = vand.u32 4294901760, %v180_v31 }
  0x23   :  { %226 = vmatpush.msra.mxu2 %v3095_v6  ;;  %269 = vmatpush.msra.mxu3 %v3089_v63  ;;  %v391_v6 = vld [vmem:[#allocation2 + $0x80] sm:$0xff] }
  0x24   :  { %152 = vmatpush.msra.mxu1 %v151_v53  ;;  %75 = vmatpush.msra.mxu0 %v3107_v13  ;;  %v401_v53 = vld [vmem:[#allocation2 + $0xd0] sm:$0xff] }
  0x25   :  { %229 = vmatpush.msra.mxu2 %v3121_v36  ;;  %271 = vmatpush.msra.mxu3 %v3107_v13  ;;  %v3195_v55 = vand.u32 4294901760, %v401_v53 }
  0x26   :  { %158 = vmatpush.msra.mxu1 %v157_v60  ;;  %77 = vmatpush.msra.mxu0 %v3111_v26  ;;  %v3207_v60 = vsub.f32 %v404_v47, %v3188_v16 }
  0x27   :  { %232 = vmatpush.msra.mxu2 %v3131_v42  ;;  %273 = vmatpush.msra.mxu3 %v3111_v26  ;;  %v3229_v31 = vsub.f32 %v401_v53, %v3195_v55 }
  0x28   :  { %284 = vmatpush.msrb.mxu0 %v89_v22  ;;  %164 = vmatpush.msra.mxu1 %v163_v2  ;;  %v405_v22 = vld [vmem:[#allocation2 + $0xf0] sm:$0xff]  ;;  %v462_v7 = vand.u32 4294901760, %v3207_v60 }
  0x29   :  { %235 = vmatpush.msra.mxu2 %v3142_v49  ;;  %277 = vmatmul.f32.vlgmr.msra.gmra.mxu3 %v80_v59 }
  0x2a   :  { %288 = vmatpush.msrb.mxu0 %v95_v23  ;;  %170 = vmatpush.msra.mxu1 %v169_v30  ;;  %v3186_v23 = vand.u32 4294901760, %v405_v22 }
  0x2b   :  { %238 = vmatmul.f32.vlgmr.msra.gmra.mxu2 %v79_v43  ;;  %83 = vmatmul.f32.vlgmr.msra.gmra.mxu0 %v82_v39  ;;  %v402_v43 = vld [vmem:[#allocation2 + $0xd8] sm:$0xff] }
  0x2c   :  { %292 = vmatpush.msrb.mxu0 %v101_v24  ;;  %176 = vmatpush.msra.mxu1 %v175_v38  ;;  %v403_v24 = vld [vmem:[#allocation2 + $0xe0] sm:$0xff]  ;;  %v3204_v59 = vsub.f32 %v405_v22, %v3186_v23  ;;  %v463_v38 = vsub.f32 %v3207_v60, %v462_v7 }
  0x2d   :  { %v3191_v19 = vand.u32 4294901760, %v403_v24  ;;  %408 = vmatpush.msrb.mxu2 %v3184_v15 }
  0x2e   :  { %296 = vmatpush.msrb.mxu0 %v107_v27  ;;  %182 = vmatpush.msra.mxu1 %v181_v44  ;;  %v3193_v27 = vand.u32 4294901760, %v402_v43  ;;  %v3252_v44 = vsub.f32 %v399_v20, %v3224_v8  ;;  %v464_v53 = vand.u32 4294901760, %v463_v38 }
  0x2f   :  { %184 = vmatmul.f32.vlgmr.msra.gmra.mxu1 %v3109_v18  ;;  %v3212_v2 = vsub.f32 %v403_v24, %v3191_v19  ;;  %410 = vmatpush.msrb.mxu2 %v3186_v23  ;;  %v480_v24 = vand.u32 4294901760, %v3229_v31 }
  0x30   :  { %351 = vmatpush.msrb.mxu1 %v2975_v3  ;;  %300 = vmatpush.msrb.mxu0 %v113_v33  ;;  %v400_v3 = vld [vmem:[#allocation2 + $0xc8] sm:$0xff]  ;;  %v3201_v33 = vsub.f32 %v406_v14, %v3184_v15 }
  0x31   :  { %v3209_v61 = vand.u32 4294901760, %v400_v3  ;;  %v468_v30 = vand.u32 4294901760, %v3212_v2  ;;  %412 = vmatpush.msrb.mxu2 %v3188_v16  ;;  %v396_v14 = vld [vmem:[#allocation2 + $0xa8] sm:$0xff] }
  0x32   :  { %353 = vmatpush.msrb.mxu1 %v2977_v4  ;;  %304 = vmatpush.msrb.mxu0 %v119_v34  ;;  %v3216_v4 = vsub.f32 %v402_v43, %v3193_v27  ;;  %v450_v21 = vand.u32 4294901760, %v3201_v33  ;;  %v456_v34 = vand.u32 4294901760, %v3204_v59  ;;  %v395_v43 = vld [vmem:[#allocation2 + $0xa0] sm:$0xff]  ;;  %v3271_v20 = vand.u32 4294901760, %v396_v14 }
  0x33   :  { %v469_v47 = vsub.f32 %v3212_v2, %v468_v30  ;;  %414 = vmatpush.msrb.mxu2 %v3191_v19 }
  0x34   :  { %355 = vmatpush.msrb.mxu1 %v2979_v5  ;;  %308 = vmatpush.msrb.mxu0 %v125_v41  ;;  %v451_v5 = vsub.f32 %v3201_v33, %v450_v21  ;;  %v457_v29 = vsub.f32 %v3204_v59, %v456_v34  ;;  %v3241_v41 = vsub.f32 %v400_v3, %v3209_v61 }
  0x35   :  { %416 = vmatpush.msrb.mxu2 %v3193_v27 }
  0x36   :  { %357 = vmatpush.msrb.mxu1 %v2981_v9  ;;  %312 = vmatpush.msrb.mxu0 %v131_v50  ;;  %v474_v9 = vand.u32 4294901760, %v3216_v4  ;;  %v397_v50 = vld [vmem:[#allocation2 + $0xb0] sm:$0xff]  ;;  %v452_v39 = vand.u32 4294901760, %v451_v5  ;;  %v458_v22 = vand.u32 4294901760, %v457_v29  ;;  %v470_v5 = vand.u32 4294901760, %v469_v47 }
  0x37   :  { %v481_v29 = vsub.f32 %v3229_v31, %v480_v24  ;;  %418 = vmatpush.msrb.mxu2 %v3195_v55 }
  0x38   :  { %359 = vmatpush.msrb.mxu1 %v2983_v10  ;;  %316 = vmatpush.msrb.mxu0 %v137_v57  ;;  %v486_v10 = vand.u32 4294901760, %v3241_v41  ;;  %v3265_v57 = vand.u32 4294901760, %v397_v50  ;;  %v475_v3 = vsub.f32 %v3216_v4, %v474_v9 }
  0x39   :  { %453 = vmatpush.msrb.mxu3 %v452_v39  ;;  %v498_v39 = vand.u32 4294901760, %v3278_v52  ;;  %420 = vmatpush.msrb.mxu2 %v3209_v61 }
  0x3a   :  { %361 = vmatpush.msrb.mxu1 %v2985_v11  ;;  %320 = vmatpush.msrb.mxu0 %v143_v62  ;;  %v492_v11 = vand.u32 4294901760, %v3252_v44  ;;  %v394_v62 = vld [vmem:[#allocation2 + $0x98] sm:$0xff]  ;;  %v3285_v38 = vsub.f32 %v397_v50, %v3265_v57  ;;  %v487_v58 = vsub.f32 %v3241_v41, %v486_v10  ;;  %v476_v40 = vand.u32 4294901760, %v475_v3 }
  0x3b   :  { %459 = vmatpush.msrb.mxu3 %v458_v22  ;;  %v3298_v50 = vsub.f32 %v396_v14, %v3271_v20  ;;  %v3300_v22 = vand.u32 4294901760, %v394_v62  ;;  %422 = vmatpush.msrb.mxu2 %v3224_v8 }
  0x3c   :  { %363 = vmatpush.msrb.mxu1 %v2997_v17  ;;  %324 = vmatpush.msrb.mxu0 %v149_v12  ;;  %v3287_v17 = vand.u32 4294901760, %v395_v43  ;;  %v393_v12 = vld [vmem:[#allocation2 + $0x90] sm:$0xff]  ;;  %v504_v47 = vand.u32 4294901760, %v3285_v38 }
  0x3d   :  { %465 = vmatpush.msrb.mxu3 %v464_v53  ;;  %v3313_v53 = vand.u32 4294901760, %v393_v12  ;;  %v510_v3 = vand.u32 4294901760, %v3298_v50  ;;  %424 = vmatpush.msrb.mxu2 %v3263_v46 }
  0x3e   :  { %365 = vmatpush.msrb.mxu1 %v3013_v25  ;;  %328 = vmatpush.msrb.mxu0 %v155_v32  ;;  %v493_v25 = vsub.f32 %v3252_v44, %v492_v11  ;;  %v482_v32 = vand.u32 4294901760, %v481_v29  ;;  %v3311_v14 = vsub.f32 %v395_v43, %v3287_v17  ;;  %v3324_v43 = vsub.f32 %v394_v62, %v3300_v22 }
  0x3f   :  { %471 = vmatpush.msrb.mxu3 %v470_v5  ;;  %v3326_v5 = vand.u32 4294901760, %v392_v0  ;;  %v505_v36 = vsub.f32 %v3285_v38, %v504_v47  ;;  %426 = vmatpush.msrb.mxu2 %v3265_v57  ;;  %v3337_v62 = vsub.f32 %v393_v12, %v3313_v53  ;;  %v3339_v29 = vand.u32 4294901760, %v391_v6 }
  0x40   :  { %367 = vmatpush.msrb.mxu1 %v3017_v28  ;;  %332 = vmatpush.msrb.mxu0 %v161_v37  ;;  %v488_v28 = vand.u32 4294901760, %v487_v58  ;;  %v499_v37 = vsub.f32 %v3278_v52, %v498_v39  ;;  %v511_v42 = vsub.f32 %v3298_v50, %v510_v3 }
  0x41   :  { %477 = vmatpush.msrb.mxu3 %v476_v40  ;;  %v3350_v58 = vsub.f32 %v392_v0, %v3326_v5  ;;  %428 = vmatpush.msrb.mxu2 %v3271_v20  ;;  %v3360_v12 = vsub.f32 %v391_v6, %v3339_v29 }
  0x42   :  { %369 = vmatpush.msrb.mxu1 %v3036_v35  ;;  %336 = vmatpush.msrb.mxu0 %v167_v48  ;;  %v494_v35 = vand.u32 4294901760, %v493_v25  ;;  %v516_v48 = vand.u32 4294901760, %v3311_v14 }
  0x43   :  { %483 = vmatpush.msrb.mxu3 %v482_v32  ;;  %v534_v25 = vand.u32 4294901760, %v3350_v58  ;;  %430 = vmatpush.msrb.mxu2 %v3287_v17  ;;  %v540_v32 = vand.u32 4294901760, %v3360_v12 }
  0x44   :  { %371 = vmatpush.msrb.mxu1 %v3053_v45  ;;  %340 = vmatpush.msrb.mxu0 %v173_v56  ;;  %v500_v45 = vand.u32 4294901760, %v499_v37  ;;  %v522_v56 = vand.u32 4294901760, %v3324_v43  ;;  %v517_v49 = vsub.f32 %v3311_v14, %v516_v48 }
  0x45   :  { %489 = vmatpush.msrb.mxu3 %v488_v28  ;;  %432 = vmatpush.msrb.mxu2 %v3300_v22  ;;  %v535_v28 = vsub.f32 %v3350_v58, %v534_v25 }
  0x46   :  { %373 = vmatpush.msrb.mxu1 %v3065_v51  ;;  %344 = vmatpush.msrb.mxu0 %v179_v1  ;;  %v506_v51 = vand.u32 4294901760, %v505_v36  ;;  %v528_v1 = vand.u32 4294901760, %v3337_v62  ;;  %v523_v40 = vsub.f32 %v3324_v43, %v522_v56  ;;  %v518_v0 = vand.u32 4294901760, %v517_v49 }
  0x47   :  { %346 = vmatmul.f32.vlgmr.msrb.gmra.mxu0 %v3109_v18  ;;  %495 = vmatpush.msrb.mxu3 %v494_v35 }
  0x48   :  { %375 = vmatpush.msrb.mxu1 %v3073_v54  ;;  %551 = vmatpush.msra.mxu0 %v3201_v33  ;;  %v512_v54 = vand.u32 4294901760, %v511_v42  ;;  %v764_v33 = vld [vmem:[#allocation2 + $0x178] sm:$0xff] }
  0x49   :  { %501 = vmatpush.msrb.mxu3 %v500_v45  ;;  %434 = vmatpush.msrb.mxu2 %v3313_v53 }
  0x4a   :  { %377 = vmatpush.msrb.mxu1 %v3089_v63  ;;  %554 = vmatpush.msra.mxu0 %v3204_v59  ;;  %v529_v63 = vsub.f32 %v3337_v62, %v528_v1  ;;  %v763_v59 = vld [vmem:[#allocation2 + $0x170] sm:$0xff] }
  0x4b   :  { %507 = vmatpush.msrb.mxu3 %v506_v51  ;;  %436 = vmatpush.msrb.mxu2 %v3326_v5 }
  0x4c   :  { %379 = vmatpush.msrb.mxu1 %v3107_v13  ;;  %557 = vmatpush.msra.mxu0 %v3207_v60  ;;  %v524_v13 = vand.u32 4294901760, %v523_v40  ;;  %v530_v6 = vand.u32 4294901760, %v529_v63  ;;  %v762_v60 = vld [vmem:[#allocation2 + $0x168] sm:$0xff] }
  0x4d   :  { %513 = vmatpush.msrb.mxu3 %v512_v54  ;;  %438 = vmatpush.msrb.mxu2 %v3339_v29 }
  0x4e   :  { %381 = vmatpush.msrb.mxu1 %v3111_v26  ;;  %560 = vmatpush.msra.mxu0 %v3212_v2  ;;  %v541_v26 = vsub.f32 %v3360_v12, %v540_v32  ;;  %v3464_v2 = vand.u32 4294901760, %v764_v33 }
  0x4f   :  { %383 = vmatmul.f32.vlgmr.msrb.gmra.mxu1 %v3109_v18  ;;  %519 = vmatpush.msrb.mxu3 %v518_v0  ;;  %v536_v18 = vand.u32 4294901760, %v535_v28 }
  0x50   :  { %604 = vmatpush.msra.mxu1 %v3184_v15  ;;  %563 = vmatpush.msra.mxu0 %v3216_v4  ;;  %v542_v37 = vand.u32 4294901760, %v541_v26  ;;  %v3466_v4 = vand.u32 4294901760, %v763_v59 }
  0x51   :  { %525 = vmatpush.msrb.mxu3 %v524_v13  ;;  %645 = vmatpush.msra.mxu2 %v450_v21  ;;  %v3468_v21 = vand.u32 4294901760, %v762_v60 }
  0x52   :  { %606 = vmatpush.msra.mxu1 %v3186_v23  ;;  %566 = vmatpush.msra.mxu0 %v3229_v31 }
  0x53   :  { %531 = vmatpush.msrb.mxu3 %v530_v6  ;;  %649 = vmatpush.msra.mxu2 %v456_v34  ;;  %v761_v34 = vld [vmem:[#allocation2 + $0x160] sm:$0xff] }
  0x54   :  { %608 = vmatpush.msra.mxu1 %v3188_v16  ;;  %569 = vmatpush.msra.mxu0 %v3241_v41  ;;  %v3470_v31 = vand.u32 4294901760, %v761_v34 }
  0x55   :  { %537 = vmatpush.msrb.mxu3 %v536_v18  ;;  %653 = vmatpush.msra.mxu2 %v462_v7  ;;  %v760_v7 = vld [vmem:[#allocation2 + $0x158] sm:$0xff] }
  0x56   :  { %610 = vmatpush.msra.mxu1 %v3191_v19  ;;  %572 = vmatpush.msra.mxu0 %v3252_v44  ;;  %v3472_v41 = vand.u32 4294901760, %v760_v7  ;;  %v758_v44 = vld [vmem:[#allocation2 + $0x148] sm:$0xff] }
  0x57   :  { %543 = vmatpush.msrb.mxu3 %v542_v37  ;;  %657 = vmatpush.msra.mxu2 %v468_v30  ;;  %v752_v37 = vld [vmem:[#allocation2 + $0x118] sm:$0xff] }
  0x58   :  { %612 = vmatpush.msra.mxu1 %v3193_v27  ;;  %575 = vmatpush.msra.mxu0 %v3278_v52  ;;  %v3489_v52 = vsub.f32 %v761_v34, %v3470_v31  ;;  %v3565_v34 = vand.u32 4294901760, %v752_v37 }
  0x59   :  { %712 = vmatpush.msra.mxu3 %v3184_v15  ;;  %661 = vmatpush.msra.mxu2 %v474_v9 }
  0x5a   :  { %614 = vmatpush.msra.mxu1 %v3195_v55  ;;  %578 = vmatpush.msra.mxu0 %v3285_v38  ;;  %v3492_v38 = vsub.f32 %v760_v7, %v3472_v41 }
  0x5b   :  { %714 = vmatpush.msra.mxu3 %v3186_v23  ;;  %665 = vmatpush.msra.mxu2 %v480_v24  ;;  %v757_v24 = vld [vmem:[#allocation2 + $0x140] sm:$0xff] }
  0x5c   :  { %616 = vmatpush.msra.mxu1 %v3209_v61  ;;  %581 = vmatpush.msra.mxu0 %v3298_v50 }
  0x5d   :  { %716 = vmatpush.msra.mxu3 %v3188_v16  ;;  %669 = vmatpush.msra.mxu2 %v486_v10  ;;  %v3477_v10 = vsub.f32 %v764_v33, %v3464_v2  ;;  %v751_v33 = vld [vmem:[#allocation2 + $0x110] sm:$0xff] }
  0x5e   :  { %618 = vmatpush.msra.mxu1 %v3224_v8  ;;  %584 = vmatpush.msra.mxu0 %v3311_v14 }
  0x5f   :  { %718 = vmatpush.msra.mxu3 %v3191_v19  ;;  %673 = vmatpush.msra.mxu2 %v492_v11  ;;  %v808_v50 = vand.u32 4294901760, %v3477_v10 }
  0x60   :  { %620 = vmatpush.msra.mxu1 %v3263_v46  ;;  %587 = vmatpush.msra.mxu0 %v3324_v43 }
  0x61   :  { %720 = vmatpush.msra.mxu3 %v3193_v27  ;;  %677 = vmatpush.msra.mxu2 %v498_v39  ;;  %v3497_v39 = vand.u32 4294901760, %v757_v24  ;;  %v809_v35 = vsub.f32 %v3477_v10, %v808_v50 }
  0x62   :  { %622 = vmatpush.msra.mxu1 %v3265_v57  ;;  %590 = vmatpush.msra.mxu0 %v3337_v62 }
  0x63   :  { %722 = vmatpush.msra.mxu3 %v3195_v55  ;;  %681 = vmatpush.msra.mxu2 %v504_v47  ;;  %v3525_v42 = vsub.f32 %v757_v24, %v3497_v39  ;;  %v810_v49 = vand.u32 4294901760, %v809_v35 }
  0x64   :  { %624 = vmatpush.msra.mxu1 %v3271_v20  ;;  %593 = vmatpush.msra.mxu0 %v3350_v58  ;;  %v755_v58 = vld [vmem:[#allocation2 + $0x130] sm:$0xff] }
  0x65   :  { %724 = vmatpush.msra.mxu3 %v3209_v61  ;;  %685 = vmatpush.msra.mxu2 %v510_v3  ;;  %v28_v61 = vlaneseq  ;;  %v832_v3 = vand.u32 4294901760, %v3492_v38  ;;  %v3536_v13 = vand.u32 4294901760, %v755_v58  ;;  %v850_v26 = vand.u32 4294901760, %v3525_v42 }
  0x66   :  { %626 = vmatpush.msra.mxu1 %v3287_v17  ;;  %596 = vmatpush.msra.mxu0 %v3360_v12  ;;  %v754_v12 = vld [vmem:[#allocation2 + $0x128] sm:$0xff] }
  0x67   :  { %726 = vmatpush.msra.mxu3 %v3224_v8  ;;  %689 = vmatpush.msra.mxu2 %v516_v48  ;;  %v759_v8 = vld [vmem:[#allocation2 + $0x150] sm:$0xff]  ;;  %v3503_v14 = vand.u32 127, %v28_v61  ;;  %v833_v54 = vsub.f32 %v3492_v38, %v832_v3  ;;  %v3542_v18 = vand.u32 4294901760, %v754_v12 }
  0x68   :  { %628 = vmatpush.msra.mxu1 %v3300_v22  ;;  %v3474_v9 = vand.u32 4294901760, %v759_v8  ;;  %766 = vmatpush.msrb.mxu0 %v3464_v2 }
  0x69   :  { %728 = vmatpush.msra.mxu3 %v3263_v46  ;;  %693 = vmatpush.msra.mxu2 %v522_v56  ;;  %v3480_v46 = vsub.f32 %v763_v59, %v3466_v4  ;;  %v756_v56 = vld [vmem:[#allocation2 + $0x138] sm:$0xff]  ;;  %vm387_vm0 = vcmp.lt.s32.totalorder %v3503_v14, 64  ;;  %v3563_v61 = vsub.f32 %v754_v12, %v3542_v18  ;;  %vm1106_vm1 = vcmp.lt.s32.totalorder %v3503_v14, 32 }
  0x6a   :  { %630 = vmatpush.msra.mxu1 %v3313_v53  ;;  %768 = vmatpush.msrb.mxu0 %v3466_v4 }
  0x6b   :  { %730 = vmatpush.msra.mxu3 %v3265_v57  ;;  %697 = vmatpush.msra.mxu2 %v528_v1  ;;  %v3483_v57 = vsub.f32 %v762_v60, %v3468_v21 }
  0x6c   :  { %632 = vmatpush.msra.mxu1 %v3326_v5  ;;  %770 = vmatpush.msrb.mxu0 %v3468_v21 }
  0x6d   :  { %732 = vmatpush.msra.mxu3 %v3271_v20  ;;  %701 = vmatpush.msra.mxu2 %v534_v25  ;;  %v3486_v20 = vand.u32 4294901760, %v758_v44  ;;  %v820_v47 = vand.u32 4294901760, %v3483_v57  ;;  %v753_v25 = vld [vmem:[#allocation2 + $0x120] sm:$0xff] }
  0x6e   :  { %634 = vmatpush.msra.mxu1 %v3339_v29  ;;  %772 = vmatpush.msrb.mxu0 %v3470_v31 }
  0x6f   :  { %734 = vmatpush.msra.mxu3 %v3287_v17  ;;  %705 = vmatpush.msra.mxu2 %v540_v32  ;;  %v3495_v17 = vsub.f32 %v759_v8, %v3474_v9  ;;  %v3508_v43 = vsub.f32 %v758_v44, %v3486_v20  ;;  %v821_v48 = vsub.f32 %v3483_v57, %v820_v47  ;;  %v3534_v32 = vand.u32 4294901760, %v756_v56 }
  0x70   :  { %811 = vmatpush.msrb.mxu1 %v810_v49  ;;  %774 = vmatpush.msrb.mxu0 %v3472_v41 }
  0x71   :  { %736 = vmatpush.msra.mxu3 %v3300_v22  ;;  %v814_v22 = vand.u32 4294901760, %v3480_v46  ;;  %v838_v45 = vand.u32 4294901760, %v3495_v17  ;;  %v844_v40 = vand.u32 4294901760, %v3508_v43  ;;  %v822_v63 = vand.u32 4294901760, %v821_v48 }
  0x72   :  { %776 = vmatpush.msrb.mxu0 %v3474_v9  ;;  %v868_v48 = vand.u32 4294901760, %v3563_v61 }
  0x73   :  { %738 = vmatpush.msra.mxu3 %v3313_v53  ;;  %v826_v53 = vand.u32 4294901760, %v3489_v52  ;;  %v815_v36 = vsub.f32 %v3480_v46, %v814_v22  ;;  %v839_v6 = vsub.f32 %v3495_v17, %v838_v45  ;;  %v845_v59 = vsub.f32 %v3508_v43, %v844_v40 }
  0x74   :  { %778 = vmatpush.msrb.mxu0 %v3486_v20 }
  0x75   :  { %740 = vmatpush.msra.mxu3 %v3326_v5  ;;  %v816_v1 = vand.u32 4294901760, %v815_v36  ;;  %v840_v8 = vand.u32 4294901760, %v839_v6  ;;  %v846_v35 = vand.u32 4294901760, %v845_v59 }
  0x76   :  { %780 = vmatpush.msrb.mxu0 %v3497_v39 }
  0x77   :  { %742 = vmatpush.msra.mxu3 %v3339_v29  ;;  %v827_v29 = vsub.f32 %v3489_v52, %v826_v53  ;;  %817 = vmatpush.msrb.mxu1 %v816_v1 }
  0x78   :  { %782 = vmatpush.msrb.mxu0 %v3534_v32 }
  0x79   :  { %v828_v28 = vand.u32 4294901760, %v827_v29  ;;  %823 = vmatpush.msrb.mxu1 %v822_v63 }
  0x7a   :  { %784 = vmatpush.msrb.mxu0 %v3536_v13 }
  0x7b   :  { %829 = vmatpush.msrb.mxu1 %v828_v28 }
  0x7c   :  { %786 = vmatpush.msrb.mxu0 %v3542_v18 }
  0xa8   :  { %v84_v23 = vpop.f32.mrf.mxu0 }
  0xac   :  { %v185_v15 = vpop.f32.mrf.mxu1  ;;  %v278_v55 = vpop.f32.mrf.mxu3 }
  0xad   :  { %v186_v16 = vadd.f32 %v185_v15, %v84_v23  ;;  %v3547_v23 = vsub.f32 %v756_v56, %v3534_v32 }
  0xae   :  { %v239_v19 = vpop.f32.mrf.mxu2 }
  0xaf   :  { %v240_v27 = vadd.f32 %v239_v19, %v186_v16  ;;  %v3551_v16 = vsub.f32 %v755_v58, %v3536_v13  ;;  %v3553_v19 = vand.u32 4294901760, %v753_v25  ;;  %v856_v60 = vand.u32 4294901760, %v3547_v23 }
  0xb1   :  { %v279_v30 = vadd.f32 %v278_v55, %v240_v27  ;;  %v834_v55 = vand.u32 4294901760, %v833_v54  ;;  %v862_v44 = vand.u32 4294901760, %v3551_v16  ;;  %v3575_v24 = vsub.f32 %v753_v25, %v3553_v19  ;;  %788 = vmatpush.msrb.mxu0 %v3553_v19 }
  0xb2   :  { %v857_v36 = vsub.f32 %v3547_v23, %v856_v60  ;;  %v869_v54 = vsub.f32 %v3563_v61, %v868_v48 }
  0xb3   :  { %835 = vmatpush.msrb.mxu1 %v834_v55  ;;  %v863_v58 = vsub.f32 %v3551_v16, %v862_v44  ;;  %790 = vmatpush.msrb.mxu0 %v3565_v34 }
  0xb4   :  { %v858_v12 = vand.u32 4294901760, %v857_v36  ;;  %v870_v6 = vand.u32 4294901760, %v869_v54  ;;  %v1117_v54 = vld [vmem:[#allocation2 + $0x1b8] sm:$0xff] }
  0xb5   :  { %841 = vmatpush.msrb.mxu1 %v840_v8  ;;  %v749_v8 = vld [vmem:[#allocation2 + $0x100] sm:$0xff] }
  0xb7   :  { %847 = vmatpush.msrb.mxu1 %v846_v35 }
  0xc4   :  { %v347_v11 = vpop.f32.mrf.mxu0 }
  0xc5   :  { %v348_v5 = vadd.f32 %v347_v11, %v279_v30  ;;  %v851_v30 = vsub.f32 %v3525_v42, %v850_v26  ;;  %v3577_v11 = vand.u32 4294901760, %v751_v33 }
  0xc7   :  { %v852_v56 = vand.u32 4294901760, %v851_v30  ;;  %v3595_v49 = vsub.f32 %v751_v33, %v3577_v11  ;;  %792 = vmatpush.msrb.mxu0 %v3577_v11 }
  0xc9   :  { %853 = vmatpush.msrb.mxu1 %v852_v56  ;;  %v886_v28 = vand.u32 4294901760, %v3595_v49 }
  0xcb   :  { %859 = vmatpush.msrb.mxu1 %v858_v12  ;;  %v887_v55 = vsub.f32 %v3595_v49, %v886_v28 }
  0xcc   :  { %v384_v62 = vpop.f32.mrf.mxu1 }
  0xcd   :  { %v385_v51 = vadd.f32 %v384_v62, %v348_v5  ;;  %v3586_v62 = vsub.f32 %v752_v37, %v3565_v34  ;;  %v888_v59 = vand.u32 4294901760, %v887_v55 }
  0xcf   :  { %v388_v0 = vmax.f32 %v385_v51, 0.0  ;;  %v880_v25 = vand.u32 4294901760, %v3586_v62 }
  0xd1   :  { %v389_v15 = vsel %vm387_vm0, %v388_v0, %v385_v51  ;;  %v874_v51 = vand.u32 4294901760, %v3575_v24  ;;  %v864_v0 = vand.u32 4294901760, %v863_v58  ;;  %v881_v37 = vsub.f32 %v3586_v62, %v880_v25 }
  0xd2   :  { %v3555_v27 = vand.u32 4294901760, %v389_v15 }
  0xd3   :  { %v875_v63 = vsub.f32 %v3575_v24, %v874_v51  ;;  %865 = vmatpush.msrb.mxu1 %v864_v0  ;;  %v882_v33 = vand.u32 4294901760, %v881_v37 }
  0xd4   :  { %v440_v7 = vsub.f32 %v389_v15, %v3555_v27  ;;  %545 = vmatmul.f32.vlgmr.msrb.gmra.mxu3 %v3555_v27 }
  0xd5   :  { %962 = vmatpush.msrb.mxu3 %v3464_v2  ;;  %v876_v15 = vand.u32 4294901760, %v875_v63  ;;  %871 = vmatpush.msrb.mxu1 %v870_v6  ;;  %v1115_v6 = vld [vmem:[#allocation2 + $0x1a8] sm:$0xff] }
  0xd6   :  { %599 = vmatmul.f32.vlgmr.msra.gmra.mxu0 %v440_v7  ;;  %v441_v5 = vand.u32 4294901760, %v440_v7 }
  0xd7   :  { %964 = vmatpush.msrb.mxu3 %v3466_v4  ;;  %877 = vmatpush.msrb.mxu1 %v876_v15 }
  0xd8   :  { %638 = vmatmul.f32.vlgmr.msra.gmra.mxu1 %v441_v5  ;;  %v442_v29 = vsub.f32 %v440_v7, %v441_v5  ;;  %v795_v5 = vand.u32 4294901760, %v749_v8 }
  0xd9   :  { %966 = vmatpush.msrb.mxu3 %v3468_v21  ;;  %883 = vmatpush.msrb.mxu1 %v882_v33  ;;  %v1114_v33 = vld [vmem:[#allocation2 + $0x1a0] sm:$0xff] }
  0xda   :  { %v443_v1 = vand.u32 4294901760, %v442_v29  ;;  %v897_v36 = vsub.f32 %v749_v8, %v795_v5  ;;  %v3752_v8 = vand.u32 4294901760, %v1117_v54 }
  0xdb   :  { %968 = vmatpush.msrb.mxu3 %v3470_v31  ;;  %889 = vmatpush.msrb.mxu1 %v888_v59 }
  0xdc   :  { %444 = vmatmul.f32.vlgmr.msrb.gmra.mxu2 %v443_v1  ;;  %744 = vmatmul.f32.vlgmr.msra.gmra.mxu3 %v3555_v27  ;;  %v898_v56 = vand.u32 4294901760, %v897_v36 }
  0xdd   :  { %909 = vmatpush.msrb.mxu2 %v3477_v10  ;;  %970 = vmatpush.msrb.mxu3 %v3472_v41 }
  0xde   :  { %v899_v1 = vsub.f32 %v897_v36, %v898_v56 }
  0xdf   :  { %912 = vmatpush.msrb.mxu2 %v3480_v46  ;;  %972 = vmatpush.msrb.mxu3 %v3474_v9 }
  0xe0   :  { %v900_v12 = vand.u32 4294901760, %v899_v1  ;;  %v3763_v1 = vsub.f32 %v1117_v54, %v3752_v8 }
  0xe1   :  { %915 = vmatpush.msrb.mxu2 %v3483_v57  ;;  %974 = vmatpush.msrb.mxu3 %v3486_v20  ;;  %v1122_v57 = vld [vmem:[#allocation2 + $0x1e0] sm:$0xff] }
  0xe3   :  { %918 = vmatpush.msrb.mxu2 %v3489_v52  ;;  %976 = vmatpush.msrb.mxu3 %v3497_v39  ;;  %v1120_v52 = vld [vmem:[#allocation2 + $0x1d0] sm:$0xff] }
  0xe4   :  { %707 = vmatmul.f32.vlgmr.msra.gmra.mxu2 %v3555_v27  ;;  %v750_v27 = vld [vmem:[#allocation2 + $0x108] sm:$0xff] }
  0xe5   :  { %921 = vmatpush.msrb.mxu2 %v3492_v38  ;;  %978 = vmatpush.msrb.mxu3 %v3534_v32  ;;  %v793_v7 = vand.u32 4294901760, %v750_v27 }
  0xe7   :  { %924 = vmatpush.msrb.mxu2 %v3495_v17  ;;  %980 = vmatpush.msrb.mxu3 %v3536_v13  ;;  %v891_v30 = vsub.f32 %v750_v27, %v793_v7  ;;  %v3691_v17 = vand.u32 4294901760, %v1122_v57 }
  0xe8   :  { %794 = vmatpush.msrb.mxu0 %v793_v7 }
  0xe9   :  { %927 = vmatpush.msrb.mxu2 %v3508_v43  ;;  %982 = vmatpush.msrb.mxu3 %v3542_v18  ;;  %v892_v35 = vand.u32 4294901760, %v891_v30 }
  0xea   :  { %796 = vmatpush.msrb.mxu0 %v795_v5 }
  0xeb   :  { %930 = vmatpush.msrb.mxu2 %v3525_v42  ;;  %984 = vmatpush.msrb.mxu3 %v3553_v19  ;;  %v893_v29 = vsub.f32 %v891_v30, %v892_v35 }
  0xec   :  { %1003 = vmatpush.msra.mxu0 %v808_v50  ;;  %v3695_v50 = vand.u32 4294901760, %v1120_v52 }
  0xed   :  { %933 = vmatpush.msrb.mxu2 %v3547_v23  ;;  %986 = vmatpush.msrb.mxu3 %v3565_v34  ;;  %v894_v58 = vand.u32 4294901760, %v893_v29  ;;  %v3759_v29 = vand.u32 4294901760, %v1115_v6 }
  0xee   :  { %1007 = vmatpush.msra.mxu0 %v814_v22  ;;  %v1119_v22 = vld [vmem:[#allocation2 + $0x1c8] sm:$0xff] }
  0xef   :  { %936 = vmatpush.msrb.mxu2 %v3551_v16  ;;  %988 = vmatpush.msrb.mxu3 %v3577_v11  ;;  %v1118_v16 = vld [vmem:[#allocation2 + $0x1c0] sm:$0xff] }
  0xf0   :  { %1011 = vmatpush.msra.mxu0 %v820_v47  ;;  %895 = vmatpush.msrb.mxu1 %v894_v58 }
  0xf1   :  { %939 = vmatpush.msrb.mxu2 %v3563_v61  ;;  %990 = vmatpush.msrb.mxu3 %v793_v7 }
  0xf2   :  { %1015 = vmatpush.msra.mxu0 %v826_v53  ;;  %901 = vmatpush.msrb.mxu1 %v900_v12 }
  0xf3   :  { %942 = vmatpush.msrb.mxu2 %v3575_v24  ;;  %992 = vmatpush.msrb.mxu3 %v795_v5 }
  0xf4   :  { %1070 = vmatpush.msra.mxu1 %v3464_v2  ;;  %1019 = vmatpush.msra.mxu0 %v832_v3  ;;  %v1125_v2 = vld [vmem:[#allocation2 + $0x1f8] sm:$0xff] }
  0xf5   :  { %945 = vmatpush.msrb.mxu2 %v3586_v62 }
  0xf6   :  { %1072 = vmatpush.msra.mxu1 %v3466_v4  ;;  %1023 = vmatpush.msra.mxu0 %v838_v45  ;;  %v1124_v4 = vld [vmem:[#allocation2 + $0x1f0] sm:$0xff]  ;;  %v3707_v45 = vand.u32 4294901760, %v1119_v22 }
  0xf7   :  { %948 = vmatpush.msrb.mxu2 %v3595_v49  ;;  %v3687_v10 = vand.u32 4294901760, %v1124_v4  ;;  %v3741_v49 = vand.u32 4294901760, %v1118_v16 }
  0xf8   :  { %1074 = vmatpush.msra.mxu1 %v3468_v21  ;;  %1027 = vmatpush.msra.mxu0 %v844_v40  ;;  %v1123_v21 = vld [vmem:[#allocation2 + $0x1e8] sm:$0xff]  ;;  %v3710_v40 = vsub.f32 %v1122_v57, %v3691_v17  ;;  %v3725_v61 = vsub.f32 %v1119_v22, %v3707_v45  ;;  %v1217_v57 = vand.u32 4294901760, %v3763_v1 }
  0xf9   :  { %951 = vmatpush.msrb.mxu2 %v891_v30  ;;  %v3689_v46 = vand.u32 4294901760, %v1123_v21  ;;  %v3701_v3 = vsub.f32 %v1124_v4, %v3687_v10 }
  0xfa   :  { %1076 = vmatpush.msra.mxu1 %v3470_v31  ;;  %1031 = vmatpush.msra.mxu0 %v850_v26  ;;  %v1205_v55 = vand.u32 4294901760, %v3725_v61 }
  0xfb   :  { %954 = vmatpush.msrb.mxu2 %v897_v36  ;;  %v3704_v43 = vsub.f32 %v1123_v21, %v3689_v46 }
  0xfc   :  { %1078 = vmatpush.msra.mxu1 %v3472_v41  ;;  %1035 = vmatpush.msra.mxu0 %v856_v60  ;;  %v1206_v21 = vsub.f32 %v3725_v61, %v1205_v55 }
  0xfd   :  { %v1181_v23 = vand.u32 4294901760, %v3704_v43 }
  0xfe   :  { %1080 = vmatpush.msra.mxu1 %v3474_v9  ;;  %1039 = vmatpush.msra.mxu0 %v862_v44  ;;  %v3685_v9 = vand.u32 4294901760, %v1125_v2 }
 0x100   :  { %1082 = vmatpush.msra.mxu1 %v3486_v20  ;;  %1043 = vmatpush.msra.mxu0 %v868_v48  ;;  %v1121_v20 = vld [vmem:[#allocation2 + $0x1d8] sm:$0xff]  ;;  %v3698_v53 = vsub.f32 %v1125_v2, %v3685_v9  ;;  %v3769_v2 = vand.u32 4294901760, %v1114_v33 }
 0x101   :  { %1127 = vmatpush.msra.mxu2 %v3685_v9 }
 0x102   :  { %1084 = vmatpush.msra.mxu1 %v3497_v39  ;;  %1047 = vmatpush.msra.mxu0 %v874_v51  ;;  %v3693_v39 = vand.u32 4294901760, %v1121_v20  ;;  %v1169_v26 = vand.u32 4294901760, %v3698_v53 }
 0x103   :  { %1129 = vmatpush.msra.mxu2 %v3687_v10 }
 0x104   :  { %1086 = vmatpush.msra.mxu1 %v3534_v32  ;;  %1051 = vmatpush.msra.mxu0 %v880_v25  ;;  %v3713_v32 = vsub.f32 %v1121_v20, %v3693_v39  ;;  %v1170_v44 = vsub.f32 %v3698_v53, %v1169_v26  ;;  %v1116_v25 = vld [vmem:[#allocation2 + $0x1b0] sm:$0xff]  ;;  %v3779_v20 = vsub.f32 %v1115_v6, %v3759_v29 }
 0x105   :  { %1131 = vmatpush.msra.mxu2 %v3689_v46  ;;  %v3754_v30 = vand.u32 4294901760, %v1116_v25 }
 0x106   :  { %1088 = vmatpush.msra.mxu1 %v3536_v13  ;;  %1055 = vmatpush.msra.mxu0 %v886_v28  ;;  %v3716_v13 = vsub.f32 %v1120_v52, %v3695_v50  ;;  %v1193_v60 = vand.u32 4294901760, %v3713_v32  ;;  %v1171_v63 = vand.u32 4294901760, %v1170_v44 }
 0x107   :  { %1133 = vmatpush.msra.mxu2 %v3691_v17  ;;  %v3767_v12 = vsub.f32 %v1116_v25, %v3754_v30 }
 0x108   :  { %1090 = vmatpush.msra.mxu1 %v3542_v18  ;;  %1059 = vmatpush.msra.mxu0 %v892_v35  ;;  %v1175_v18 = vand.u32 4294901760, %v3701_v3  ;;  %v1199_v51 = vand.u32 4294901760, %v3716_v13  ;;  %v1194_v15 = vsub.f32 %v3713_v32, %v1193_v60 }
 0x109   :  { %1172 = vmatpush.msra.mxu3 %v1171_v63  ;;  %1135 = vmatpush.msra.mxu2 %v3693_v39 }
 0x10a   :  { %1092 = vmatpush.msra.mxu1 %v3553_v19  ;;  %1063 = vmatpush.msra.mxu0 %v898_v56  ;;  %v1187_v19 = vand.u32 4294901760, %v3710_v40  ;;  %v1176_v24 = vsub.f32 %v3701_v3, %v1175_v18  ;;  %v1200_v36 = vsub.f32 %v3716_v13, %v1199_v51  ;;  %v1113_v56 = vld [vmem:[#allocation2 + $0x198] sm:$0xff] }
 0x10b   :  { %1137 = vmatpush.msra.mxu2 %v3695_v50  ;;  %v3781_v52 = vand.u32 4294901760, %v1113_v56 }
 0x10c   :  { %1094 = vmatpush.msra.mxu1 %v3565_v34  ;;  %v1188_v62 = vsub.f32 %v3710_v40, %v1187_v19  ;;  %v1177_v28 = vand.u32 4294901760, %v1176_v24  ;;  %v1201_v22 = vand.u32 4294901760, %v1200_v36  ;;  %v1207_v24 = vand.u32 4294901760, %v1206_v21 }
 0x10d   :  { %1139 = vmatpush.msra.mxu2 %v3707_v45 }
 0x10e   :  { %1096 = vmatpush.msra.mxu1 %v3577_v11  ;;  %v1182_v11 = vsub.f32 %v3704_v43, %v1181_v23  ;;  %v1189_v35 = vand.u32 4294901760, %v1188_v62  ;;  %1178 = vmatpush.msra.mxu3 %v1177_v28  ;;  %v3802_v62 = vsub.f32 %v1113_v56, %v3781_v52 }
 0x10f   :  { %1141 = vmatpush.msra.mxu2 %v3741_v49 }
 0x110   :  { %1098 = vmatpush.msra.mxu1 %v793_v7  ;;  %v1183_v27 = vand.u32 4294901760, %v1182_v11  ;;  %v3749_v7 = vsub.f32 %v1118_v16, %v3741_v49  ;;  %v3791_v16 = vsub.f32 %v1114_v33, %v3769_v2  ;;  %v1218_v11 = vsub.f32 %v3763_v1, %v1217_v57 }
 0x111   :  { %1143 = vmatpush.msra.mxu2 %v3752_v8  ;;  %v1241_v33 = vand.u32 4294901760, %v3802_v62 }
 0x112   :  { %1100 = vmatpush.msra.mxu1 %v795_v5  ;;  %v1211_v58 = vand.u32 4294901760, %v3749_v7  ;;  %1184 = vmatpush.msra.mxu3 %v1183_v27  ;;  %v1235_v63 = vand.u32 4294901760, %v3791_v16 }
 0x113   :  { %1145 = vmatpush.msra.mxu2 %v3754_v30  ;;  %v1242_v36 = vsub.f32 %v3802_v62, %v1241_v33 }
 0x114   :  { %1190 = vmatpush.msra.mxu3 %v1189_v35  ;;  %v1236_v27 = vsub.f32 %v3791_v16, %v1235_v63 }
 0x115   :  { %1147 = vmatpush.msra.mxu2 %v3759_v29 }
 0x116   :  { %v1237_v56 = vand.u32 4294901760, %v1236_v27 }
 0x117   :  { %1149 = vmatpush.msra.mxu2 %v3769_v2 }
 0x119   :  { %1151 = vmatpush.msra.mxu2 %v3781_v52 }
 0x153   :  { %v600_v47 = vpop.f32.mrf.mxu0 }
 0x155   :  { %v639_v34 = vpop.f32.mrf.mxu1 }
 0x157   :  { %v546_v31 = vpop.f32.mrf.mxu3 }
 0x15f   :  { %v445_v41 = vpop.f32.mrf.mxu2  ;;  %v745_v59 = vpop.f32.mrf.mxu3 }
 0x160   :  { %v547_v38 = vadd.f32 %v546_v31, %v445_v41  ;;  %v1112_v31 = vld [vmem:[#allocation2 + $0x190] sm:$0xff]  ;;  %v1195_v41 = vand.u32 4294901760, %v1194_v15 }
 0x162   :  { %v601_v42 = vadd.f32 %v600_v47, %v547_v38  ;;  %v1212_v47 = vsub.f32 %v3749_v7, %v1211_v58  ;;  %1196 = vmatpush.msra.mxu3 %v1195_v41 }
 0x164   :  { %v640_v48 = vadd.f32 %v639_v34, %v601_v42  ;;  %v1223_v42 = vand.u32 4294901760, %v3767_v12  ;;  %v3793_v34 = vand.u32 4294901760, %v1112_v31  ;;  %1202 = vmatpush.msra.mxu3 %v1201_v22  ;;  %v1213_v25 = vand.u32 4294901760, %v1212_v47  ;;  %v1110_v22 = vld [vmem:[#allocation2 + $0x180] sm:$0xff] }
 0x166   :  { %v3811_v28 = vsub.f32 %v1112_v31, %v3793_v34  ;;  %1208 = vmatpush.msra.mxu3 %v1207_v24  ;;  %1153 = vmatpush.msra.mxu2 %v3793_v34  ;;  %v1243_v31 = vand.u32 4294901760, %v1242_v36 }
 0x167   :  { %v708_v0 = vpop.f32.mrf.mxu2 }
 0x168   :  { %v709_v37 = vadd.f32 %v708_v0, %v640_v48  ;;  %v1229_v48 = vand.u32 4294901760, %v3779_v20  ;;  %v1224_v0 = vsub.f32 %v3767_v12, %v1223_v42  ;;  %1214 = vmatpush.msra.mxu3 %v1213_v25 }
 0x16a   :  { %v746_v5 = vadd.f32 %v745_v59, %v709_v37  ;;  %v1219_v37 = vand.u32 4294901760, %v1218_v11  ;;  %v1230_v15 = vsub.f32 %v3779_v20, %v1229_v48  ;;  %v1225_v59 = vand.u32 4294901760, %v1224_v0 }
 0x16c   :  { %v3771_v4 = vand.u32 4294901760, %v746_v5  ;;  %1220 = vmatpush.msra.mxu3 %v1219_v37  ;;  %v1231_v35 = vand.u32 4294901760, %v1230_v15 }
 0x16e   :  { %v798_v38 = vsub.f32 %v746_v5, %v3771_v4  ;;  %903 = vmatmul.f32.vlgmr.msrb.gmra.mxu1 %v3771_v4  ;;  %v1247_v5 = vand.u32 4294901760, %v3811_v28  ;;  %1226 = vmatpush.msra.mxu3 %v1225_v59 }
 0x16f   :  { %1323 = vmatpush.msrb.mxu1 %v3685_v9 }
 0x170   :  { %957 = vmatmul.f32.vlgmr.msrb.gmra.mxu2 %v798_v38  ;;  %v799_v44 = vand.u32 4294901760, %v798_v38  ;;  %v1248_v21 = vsub.f32 %v3811_v28, %v1247_v5  ;;  %1232 = vmatpush.msra.mxu3 %v1231_v35 }
 0x171   :  { %1325 = vmatpush.msrb.mxu1 %v3687_v10 }
 0x172   :  { %996 = vmatmul.f32.vlgmr.msrb.gmra.mxu3 %v799_v44  ;;  %v800_v54 = vsub.f32 %v798_v38, %v799_v44  ;;  %v1249_v41 = vand.u32 4294901760, %v1248_v21  ;;  %v1156_v44 = vand.u32 4294901760, %v1110_v22 }
 0x173   :  { %1327 = vmatpush.msrb.mxu1 %v3689_v46  ;;  %1238 = vmatpush.msra.mxu3 %v1237_v56 }
 0x174   :  { %v801_v6 = vand.u32 4294901760, %v800_v54  ;;  %v1258_v11 = vsub.f32 %v1110_v22, %v1156_v44 }
 0x175   :  { %1329 = vmatpush.msrb.mxu1 %v3691_v17  ;;  %1244 = vmatpush.msra.mxu3 %v1243_v31 }
 0x176   :  { %802 = vmatmul.f32.vlgmr.msrb.gmra.mxu0 %v801_v6  ;;  %1102 = vmatmul.f32.vlgmr.msra.gmra.mxu1 %v3771_v4  ;;  %v1259_v25 = vand.u32 4294901760, %v1258_v11 }
 0x177   :  { %1270 = vmatpush.msrb.mxu0 %v3698_v53  ;;  %1331 = vmatpush.msrb.mxu1 %v3693_v39 }
 0x178   :  { %1250 = vmatpush.msra.mxu3 %v1249_v41  ;;  %v1260_v6 = vsub.f32 %v1258_v11, %v1259_v25  ;;  %v1487_v41 = vld [vmem:[#allocation2 + $0x240] sm:$0xff] }
 0x179   :  { %1273 = vmatpush.msrb.mxu0 %v3701_v3  ;;  %1333 = vmatpush.msrb.mxu1 %v3695_v50 }
 0x17a   :  { %v1261_v37 = vand.u32 4294901760, %v1260_v6 }
 0x17b   :  { %1276 = vmatpush.msrb.mxu0 %v3704_v43  ;;  %1335 = vmatpush.msrb.mxu1 %v3707_v45 }
 0x17d   :  { %1279 = vmatpush.msrb.mxu0 %v3710_v40  ;;  %1337 = vmatpush.msrb.mxu1 %v3741_v49 }
 0x17e   :  { %1065 = vmatmul.f32.vlgmr.msra.gmra.mxu0 %v3771_v4  ;;  %v1111_v4 = vld [vmem:[#allocation2 + $0x188] sm:$0xff] }
 0x17f   :  { %1282 = vmatpush.msrb.mxu0 %v3713_v32  ;;  %1339 = vmatpush.msrb.mxu1 %v3752_v8  ;;  %v1154_v38 = vand.u32 4294901760, %v1111_v4 }
 0x181   :  { %1285 = vmatpush.msrb.mxu0 %v3716_v13  ;;  %1341 = vmatpush.msrb.mxu1 %v3754_v30  ;;  %v1252_v47 = vsub.f32 %v1111_v4, %v1154_v38 }
 0x182   :  { %1155 = vmatpush.msra.mxu2 %v1154_v38 }
 0x183   :  { %1288 = vmatpush.msrb.mxu0 %v3725_v61  ;;  %1343 = vmatpush.msrb.mxu1 %v3759_v29  ;;  %v1253_v24 = vand.u32 4294901760, %v1252_v47  ;;  %v1494_v61 = vld [vmem:[#allocation2 + $0x278] sm:$0xff] }
 0x184   :  { %1157 = vmatpush.msra.mxu2 %v1156_v44 }
 0x185   :  { %1291 = vmatpush.msrb.mxu0 %v3749_v7  ;;  %1345 = vmatpush.msrb.mxu1 %v3769_v2  ;;  %v1254_v54 = vsub.f32 %v1252_v47, %v1253_v24 }
 0x186   :  { %1364 = vmatpush.msrb.mxu2 %v1169_v26 }
 0x187   :  { %1294 = vmatpush.msrb.mxu0 %v3763_v1  ;;  %1347 = vmatpush.msrb.mxu1 %v3781_v52  ;;  %v1255_v0 = vand.u32 4294901760, %v1254_v54  ;;  %v1491_v1 = vld [vmem:[#allocation2 + $0x260] sm:$0xff] }
 0x188   :  { %1368 = vmatpush.msrb.mxu2 %v1175_v18 }
 0x189   :  { %1297 = vmatpush.msrb.mxu0 %v3767_v12  ;;  %1349 = vmatpush.msrb.mxu1 %v3793_v34 }
 0x18a   :  { %1372 = vmatpush.msrb.mxu2 %v1181_v23  ;;  %1256 = vmatpush.msra.mxu3 %v1255_v0 }
 0x18b   :  { %1300 = vmatpush.msrb.mxu0 %v3779_v20  ;;  %1351 = vmatpush.msrb.mxu1 %v1154_v38  ;;  %v3929_v20 = vand.u32 4294901760, %v1491_v1 }
 0x18c   :  { %1376 = vmatpush.msrb.mxu2 %v1187_v19  ;;  %1262 = vmatpush.msra.mxu3 %v1261_v37  ;;  %v1485_v37 = vld [vmem:[#allocation2 + $0x230] sm:$0xff] }
 0x18d   :  { %1303 = vmatpush.msrb.mxu0 %v3791_v16  ;;  %1353 = vmatpush.msrb.mxu1 %v1156_v44 }
 0x18e   :  { %1431 = vmatpush.msrb.mxu3 %v3685_v9  ;;  %1380 = vmatpush.msrb.mxu2 %v1193_v60 }
 0x18f   :  { %1306 = vmatpush.msrb.mxu0 %v3802_v62 }
 0x190   :  { %1433 = vmatpush.msrb.mxu3 %v3687_v10  ;;  %1384 = vmatpush.msrb.mxu2 %v1199_v51  ;;  %v3904_v51 = vand.u32 4294901760, %v1494_v61 }
 0x191   :  { %1309 = vmatpush.msrb.mxu0 %v3811_v28 }
 0x192   :  { %1435 = vmatpush.msrb.mxu3 %v3689_v46  ;;  %1388 = vmatpush.msrb.mxu2 %v1205_v55  ;;  %v3907_v55 = vsub.f32 %v1494_v61, %v3904_v51 }
 0x193   :  { %1312 = vmatpush.msrb.mxu0 %v1252_v47  ;;  %v3973_v47 = vand.u32 4294901760, %v1487_v41 }
 0x194   :  { %1437 = vmatpush.msrb.mxu3 %v3691_v17  ;;  %1392 = vmatpush.msrb.mxu2 %v1211_v58 }
 0x195   :  { %1315 = vmatpush.msrb.mxu0 %v1258_v11 }
 0x196   :  { %1439 = vmatpush.msrb.mxu3 %v3693_v39  ;;  %1396 = vmatpush.msrb.mxu2 %v1217_v57 }
 0x197   :  { %1496 = vmatpush.msra.mxu0 %v3904_v51 }
 0x198   :  { %1441 = vmatpush.msrb.mxu3 %v3695_v50  ;;  %1400 = vmatpush.msrb.mxu2 %v1223_v42 }
 0x19a   :  { %1443 = vmatpush.msrb.mxu3 %v3707_v45  ;;  %1404 = vmatpush.msrb.mxu2 %v1229_v48  ;;  %v3939_v48 = vsub.f32 %v1491_v1, %v3929_v20 }
 0x19c   :  { %1445 = vmatpush.msrb.mxu3 %v3741_v49  ;;  %1408 = vmatpush.msrb.mxu2 %v1235_v63  ;;  %v1493_v49 = vld [vmem:[#allocation2 + $0x270] sm:$0xff] }
 0x19d   :  { %v3909_v7 = vand.u32 4294901760, %v1493_v49  ;;  %v1489_v63 = vld [vmem:[#allocation2 + $0x250] sm:$0xff] }
 0x19e   :  { %1447 = vmatpush.msrb.mxu3 %v3752_v8  ;;  %1412 = vmatpush.msrb.mxu2 %v1241_v33  ;;  %v1492_v8 = vld [vmem:[#allocation2 + $0x268] sm:$0xff]  ;;  %v1556_v33 = vand.u32 4294901760, %v3939_v48  ;;  %v3950_v59 = vand.u32 4294901760, %v1489_v63 }
 0x19f   :  { %v3917_v58 = vand.u32 4294901760, %v1492_v8  ;;  %1498 = vmatpush.msra.mxu0 %v3909_v7 }
 0x1a0   :  { %1449 = vmatpush.msrb.mxu3 %v3754_v30  ;;  %1416 = vmatpush.msrb.mxu2 %v1247_v5  ;;  %v1538_v30 = vand.u32 4294901760, %v3907_v55  ;;  %v1488_v5 = vld [vmem:[#allocation2 + $0x248] sm:$0xff]  ;;  %v1557_v36 = vsub.f32 %v3939_v48, %v1556_v33  ;;  %v3962_v56 = vsub.f32 %v1489_v63, %v3950_v59 }
 0x1a1   :  { %v3927_v57 = vsub.f32 %v1492_v8, %v3917_v58  ;;  %1500 = vmatpush.msra.mxu0 %v3917_v58  ;;  %v3964_v21 = vand.u32 4294901760, %v1488_v5 }
 0x1a2   :  { %1451 = vmatpush.msrb.mxu3 %v3759_v29  ;;  %1420 = vmatpush.msrb.mxu2 %v1253_v24  ;;  %v3915_v29 = vsub.f32 %v1493_v49, %v3909_v7  ;;  %v1539_v12 = vsub.f32 %v3907_v55, %v1538_v30  ;;  %v1558_v4 = vand.u32 4294901760, %v1557_v36  ;;  %v1486_v24 = vld [vmem:[#allocation2 + $0x238] sm:$0xff] }
 0x1a3   :  { %1502 = vmatpush.msra.mxu0 %v3929_v20  ;;  %v3971_v22 = vsub.f32 %v1488_v5, %v3964_v21  ;;  %v3988_v0 = vand.u32 4294901760, %v1486_v24  ;;  %v1480_v5 = vld [vmem:[#allocation2 + $0x208] sm:$0xff] }
 0x1a4   :  { %1453 = vmatpush.msrb.mxu3 %v3769_v2  ;;  %1424 = vmatpush.msrb.mxu2 %v1259_v25  ;;  %v1544_v2 = vand.u32 4294901760, %v3915_v29  ;;  %v1540_v42 = vand.u32 4294901760, %v1539_v12  ;;  %v3986_v25 = vsub.f32 %v1487_v41, %v3973_v47 }
 0x1a5   :  { %v1574_v54 = vand.u32 4294901760, %v3971_v22 }
 0x1a6   :  { %1455 = vmatpush.msrb.mxu3 %v3781_v52  ;;  %v1490_v52 = vld [vmem:[#allocation2 + $0x258] sm:$0xff]  ;;  %v1545_v16 = vsub.f32 %v3915_v29, %v1544_v2  ;;  %1541 = vmatpush.msra.mxu1 %v1540_v42 }
 0x1a7   :  { %v3943_v62 = vand.u32 4294901760, %v1490_v52 }
 0x1a8   :  { %1457 = vmatpush.msrb.mxu3 %v3793_v34  ;;  %v1550_v34 = vand.u32 4294901760, %v3927_v57  ;;  %v1546_v28 = vand.u32 4294901760, %v1545_v16 }
 0x1a9   :  { %v3954_v27 = vsub.f32 %v1490_v52, %v3943_v62  ;;  %1504 = vmatpush.msra.mxu0 %v3943_v62  ;;  %v1481_v52 = vld [vmem:[#allocation2 + $0x210] sm:$0xff] }
 0x1aa   :  { %1459 = vmatpush.msrb.mxu3 %v1154_v38  ;;  %v1551_v15 = vsub.f32 %v3927_v57, %v1550_v34  ;;  %1547 = vmatpush.msra.mxu1 %v1546_v28  ;;  %v1568_v38 = vand.u32 4294901760, %v3962_v56  ;;  %v4047_v28 = vand.u32 4294901760, %v1481_v52 }
 0x1ab   :  { %v1562_v31 = vand.u32 4294901760, %v3954_v27  ;;  %1506 = vmatpush.msra.mxu0 %v3950_v59 }
 0x1ac   :  { %1461 = vmatpush.msrb.mxu3 %v1156_v44  ;;  %v1552_v35 = vand.u32 4294901760, %v1551_v15  ;;  %v1569_v11 = vsub.f32 %v3962_v56, %v1568_v38 }
 0x1ad   :  { %v1563_v44 = vsub.f32 %v3954_v27, %v1562_v31  ;;  %1508 = vmatpush.msra.mxu0 %v3964_v21 }
 0x1ae   :  { %1553 = vmatpush.msra.mxu1 %v1552_v35 }
 0x1af   :  { %v1564_v6 = vand.u32 4294901760, %v1563_v44  ;;  %1510 = vmatpush.msra.mxu0 %v3973_v47  ;;  %v4061_v44 = vand.u32 4294901760, %v1480_v5 }
 0x1b0   :  { %1559 = vmatpush.msra.mxu1 %v1558_v4  ;;  %v4057_v4 = vsub.f32 %v1481_v52, %v4047_v28 }
 0x1b1   :  { %1512 = vmatpush.msra.mxu0 %v3988_v0 }
 0x1b2   :  { %1565 = vmatpush.msra.mxu1 %v1564_v6 }
 0x1eb   :  { %v904_v9 = vpop.f32.mrf.mxu1 }
 0x1f3   :  { %v803_v10 = vpop.f32.mrf.mxu0  ;;  %v958_v17 = vpop.f32.mrf.mxu2 }
 0x1f4   :  { %v905_v46 = vadd.f32 %v904_v9, %v803_v10  ;;  %v1103_v45 = vpop.f32.mrf.mxu1  ;;  %v1570_v9 = vand.u32 4294901760, %v1569_v11  ;;  %v1575_v10 = vsub.f32 %v3971_v22, %v1574_v54 }
 0x1f5   :  { %v997_v50 = vpop.f32.mrf.mxu3 }
 0x1f6   :  { %v959_v39 = vadd.f32 %v958_v17, %v905_v46  ;;  %v1580_v46 = vand.u32 4294901760, %v3986_v25  ;;  %v3998_v17 = vsub.f32 %v1486_v24, %v3988_v0  ;;  %1571 = vmatpush.msra.mxu1 %v1570_v9  ;;  %v1479_v24 = vld [vmem:[#allocation2 + $0x200] sm:$0xff] }
 0x1f7   :  { %v4068_v9 = vand.u32 4294901760, %v1479_v24 }
 0x1f8   :  { %v998_v53 = vadd.f32 %v997_v50, %v959_v39  ;;  %v4001_v39 = vand.u32 4294901760, %v1485_v37  ;;  %v1484_v50 = vld [vmem:[#allocation2 + $0x228] sm:$0xff] }
 0x1fa   :  { %1514 = vmatpush.msra.mxu0 %v4001_v39 }
 0x1fb   :  { %v1066_v3 = vpop.f32.mrf.mxu0 }
 0x1fc   :  { %v1067_v43 = vadd.f32 %v1066_v3, %v998_v53  ;;  %v1576_v53 = vand.u32 4294901760, %v1575_v10  ;;  %v1581_v3 = vsub.f32 %v3986_v25, %v1580_v46  ;;  %v1621_v10 = vsub.f32 %v1480_v5, %v4061_v44 }
 0x1fe   :  { %v1104_v40 = vadd.f32 %v1103_v45, %v1067_v43  ;;  %v1586_v43 = vand.u32 4294901760, %v3998_v17  ;;  %v4008_v45 = vand.u32 4294901760, %v1484_v50  ;;  %1577 = vmatpush.msra.mxu1 %v1576_v53 }
 0x200   :  { %v1107_v32 = vmax.f32 %v1104_v40, 0.0  ;;  %1516 = vmatpush.msra.mxu0 %v4008_v45 }
 0x202   :  { %v1108_v13 = vsel %vm1106_vm1, %v1107_v32, %v1104_v40  ;;  %v4013_v40 = vsub.f32 %v1485_v37, %v4001_v39  ;;  %v1483_v32 = vld [vmem:[#allocation2 + $0x220] sm:$0xff]  ;;  %v1616_v37 = vand.u32 4294901760, %v4057_v4 }
 0x203   :  { %v1158_v26 = vand.u32 4294901760, %v1108_v13 }
 0x204   :  { %v1617_v53 = vsub.f32 %v4057_v4, %v1616_v37 }
 0x205   :  { %1264 = vmatmul.f32.vlgmr.msra.gmra.mxu3 %v1158_v26  ;;  %v1159_v18 = vsub.f32 %v1108_v13, %v1158_v26  ;;  %v1582_v13 = vand.u32 4294901760, %v1581_v3  ;;  %v1627_v3 = vsub.f32 %v1479_v24, %v4068_v9 }
 0x206   :  { %1692 = vmatpush.msra.mxu3 %v3904_v51 }
 0x207   :  { %1318 = vmatmul.f32.vlgmr.msrb.gmra.mxu0 %v1159_v18  ;;  %v1160_v23 = vand.u32 4294901760, %v1159_v18  ;;  %1583 = vmatpush.msra.mxu1 %v1582_v13  ;;  %v1618_v13 = vand.u32 4294901760, %v1617_v53 }
 0x208   :  { %1694 = vmatpush.msra.mxu3 %v3909_v7 }
 0x209   :  { %1357 = vmatmul.f32.vlgmr.msrb.gmra.mxu1 %v1160_v23  ;;  %v1161_v19 = vsub.f32 %v1159_v18, %v1160_v23  ;;  %v4020_v18 = vsub.f32 %v1484_v50, %v4008_v45  ;;  %v4022_v23 = vand.u32 4294901760, %v1483_v32 }
 0x20a   :  { %1696 = vmatpush.msra.mxu3 %v3917_v58 }
 0x20b   :  { %v1162_v60 = vand.u32 4294901760, %v1161_v19  ;;  %v1592_v19 = vand.u32 4294901760, %v4013_v40  ;;  %v1598_v49 = vand.u32 4294901760, %v4020_v18  ;;  %v4030_v8 = vsub.f32 %v1483_v32, %v4022_v23  ;;  %1518 = vmatpush.msra.mxu0 %v4022_v23 }
 0x20c   :  { %1698 = vmatpush.msra.mxu3 %v3929_v20  ;;  %v1622_v32 = vand.u32 4294901760, %v1621_v10 }
 0x20d   :  { %1163 = vmatmul.f32.vlgmr.msra.gmra.mxu2 %v1162_v60  ;;  %1463 = vmatmul.f32.vlgmr.msrb.gmra.mxu3 %v1158_v26  ;;  %v1482_v60 = vld [vmem:[#allocation2 + $0x218] sm:$0xff]  ;;  %v1593_v12 = vsub.f32 %v4013_v40, %v1592_v19  ;;  %v1599_v42 = vsub.f32 %v4020_v18, %v1598_v49  ;;  %v1604_v16 = vand.u32 4294901760, %v4030_v8 }
 0x20e   :  { %1639 = vmatpush.msra.mxu2 %v3907_v55  ;;  %1700 = vmatpush.msra.mxu3 %v3943_v62  ;;  %v4032_v1 = vand.u32 4294901760, %v1482_v60 }
 0x20f   :  { %v1594_v15 = vand.u32 4294901760, %v1593_v12  ;;  %v1600_v35 = vand.u32 4294901760, %v1599_v42  ;;  %v1605_v36 = vsub.f32 %v4030_v8, %v1604_v16 }
 0x210   :  { %1642 = vmatpush.msra.mxu2 %v3915_v29  ;;  %1702 = vmatpush.msra.mxu3 %v3950_v59  ;;  %v4045_v63 = vsub.f32 %v1482_v60, %v4032_v1  ;;  %v1623_v60 = vsub.f32 %v1621_v10, %v1622_v32 }
 0x211   :  { %1520 = vmatpush.msra.mxu0 %v4032_v1  ;;  %v1606_v11 = vand.u32 4294901760, %v1605_v36 }
 0x212   :  { %1645 = vmatpush.msra.mxu2 %v3927_v57  ;;  %1704 = vmatpush.msra.mxu3 %v3964_v21  ;;  %v1610_v41 = vand.u32 4294901760, %v4045_v63  ;;  %v1624_v12 = vand.u32 4294901760, %v1623_v60 }
 0x213   :  { %1522 = vmatpush.msra.mxu0 %v4047_v28 }
 0x214   :  { %1648 = vmatpush.msra.mxu2 %v3939_v48  ;;  %1706 = vmatpush.msra.mxu3 %v3973_v47  ;;  %v1611_v6 = vsub.f32 %v4045_v63, %v1610_v41 }
 0x215   :  { %1426 = vmatmul.f32.vlgmr.msrb.gmra.mxu2 %v1158_v26  ;;  %v1587_v26 = vsub.f32 %v3998_v17, %v1586_v43  ;;  %1524 = vmatpush.msra.mxu0 %v4061_v44 }
 0x216   :  { %1651 = vmatpush.msra.mxu2 %v3954_v27  ;;  %1708 = vmatpush.msra.mxu3 %v3988_v0  ;;  %v1612_v50 = vand.u32 4294901760, %v1611_v6 }
 0x217   :  { %v1588_v61 = vand.u32 4294901760, %v1587_v26  ;;  %1526 = vmatpush.msra.mxu0 %v4068_v9  ;;  %v1628_v26 = vand.u32 4294901760, %v1627_v3 }
 0x218   :  { %1654 = vmatpush.msra.mxu2 %v3962_v56  ;;  %1710 = vmatpush.msra.mxu3 %v4001_v39 }
 0x219   :  { %1589 = vmatpush.msra.mxu1 %v1588_v61  ;;  %1733 = vmatpush.msrb.mxu0 %v1538_v30  ;;  %v1629_v61 = vsub.f32 %v1627_v3, %v1628_v26 }
 0x21a   :  { %1657 = vmatpush.msra.mxu2 %v3971_v22  ;;  %1712 = vmatpush.msra.mxu3 %v4008_v45 }
 0x21b   :  { %1595 = vmatpush.msra.mxu1 %v1594_v15  ;;  %1737 = vmatpush.msrb.mxu0 %v1544_v2  ;;  %v1630_v52 = vand.u32 4294901760, %v1629_v61 }
 0x21c   :  { %1660 = vmatpush.msra.mxu2 %v3986_v25  ;;  %1714 = vmatpush.msra.mxu3 %v4022_v23  ;;  %v1850_v25 = vld [vmem:[#allocation2 + $0x2e0] sm:$0xff] }
 0x21d   :  { %1601 = vmatpush.msra.mxu1 %v1600_v35  ;;  %1741 = vmatpush.msrb.mxu0 %v1550_v34 }
 0x21e   :  { %1663 = vmatpush.msra.mxu2 %v3998_v17  ;;  %1716 = vmatpush.msra.mxu3 %v4032_v1  ;;  %v4131_v17 = vand.u32 4294901760, %v1850_v25 }
 0x21f   :  { %1607 = vmatpush.msra.mxu1 %v1606_v11  ;;  %1745 = vmatpush.msrb.mxu0 %v1556_v33 }
 0x220   :  { %1666 = vmatpush.msra.mxu2 %v4013_v40  ;;  %1718 = vmatpush.msra.mxu3 %v4047_v28  ;;  %v1846_v40 = vld [vmem:[#allocation2 + $0x2c0] sm:$0xff] }
 0x221   :  { %1613 = vmatpush.msra.mxu1 %v1612_v50  ;;  %1749 = vmatpush.msrb.mxu0 %v1562_v31  ;;  %v1852_v31 = vld [vmem:[#allocation2 + $0x2f0] sm:$0xff]  ;;  %v4162_v15 = vand.u32 4294901760, %v1846_v40 }
 0x222   :  { %1669 = vmatpush.msra.mxu2 %v4020_v18  ;;  %1720 = vmatpush.msra.mxu3 %v4061_v44  ;;  %v1844_v50 = vld [vmem:[#allocation2 + $0x2b0] sm:$0xff] }
 0x223   :  { %1619 = vmatpush.msra.mxu1 %v1618_v13  ;;  %1753 = vmatpush.msrb.mxu0 %v1568_v38  ;;  %v1851_v38 = vld [vmem:[#allocation2 + $0x2e8] sm:$0xff]  ;;  %v4188_v13 = vsub.f32 %v1846_v40, %v4162_v15 }
 0x224   :  { %1672 = vmatpush.msra.mxu2 %v4030_v8  ;;  %1722 = vmatpush.msra.mxu3 %v4068_v9  ;;  %v4150_v8 = vsub.f32 %v1850_v25, %v4131_v17  ;;  %v1839_v40 = vld [vmem:[#allocation2 + $0x288] sm:$0xff] }
 0x225   :  { %1625 = vmatpush.msra.mxu1 %v1624_v12  ;;  %1757 = vmatpush.msrb.mxu0 %v1574_v54  ;;  %v4129_v54 = vand.u32 4294901760, %v1851_v38  ;;  %v1842_v12 = vld [vmem:[#allocation2 + $0x2a0] sm:$0xff] }
 0x226   :  { %1675 = vmatpush.msra.mxu2 %v4045_v63  ;;  %v1915_v36 = vand.u32 4294901760, %v4150_v8 }
 0x227   :  { %1631 = vmatpush.msra.mxu1 %v1630_v52  ;;  %1761 = vmatpush.msrb.mxu0 %v1580_v46  ;;  %v1848_v46 = vld [vmem:[#allocation2 + $0x2d0] sm:$0xff]  ;;  %v2927_v52 = vld [vmem:[%s4822_s0] sm:$0xff] }
 0x228   :  { %1678 = vmatpush.msra.mxu2 %v4057_v4 }
 0x229   :  { %1800 = vmatpush.msrb.mxu1 %v3904_v51  ;;  %1765 = vmatpush.msrb.mxu0 %v1586_v43  ;;  %v4135_v43 = vand.u32 4294901760, %v1848_v46 }
 0x22a   :  { %1681 = vmatpush.msra.mxu2 %v1621_v10  ;;  %v1845_v10 = vld [vmem:[#allocation2 + $0x2b8] sm:$0xff] }
 0x22b   :  { %1802 = vmatpush.msrb.mxu1 %v3909_v7  ;;  %1769 = vmatpush.msrb.mxu0 %v1592_v19  ;;  %v4144_v19 = vsub.f32 %v1851_v38, %v4129_v54  ;;  %v4156_v42 = vsub.f32 %v1848_v46, %v4135_v43 }
 0x22c   :  { %1684 = vmatpush.msra.mxu2 %v1627_v3 }
 0x22d   :  { %1804 = vmatpush.msrb.mxu1 %v3917_v58  ;;  %1773 = vmatpush.msrb.mxu0 %v1598_v49 }
 0x22f   :  { %1806 = vmatpush.msrb.mxu1 %v3929_v20  ;;  %1777 = vmatpush.msrb.mxu0 %v1604_v16 }
 0x231   :  { %1808 = vmatpush.msrb.mxu1 %v3943_v62  ;;  %1781 = vmatpush.msrb.mxu0 %v1610_v41 }
 0x233   :  { %1810 = vmatpush.msrb.mxu1 %v3950_v59  ;;  %1785 = vmatpush.msrb.mxu0 %v1616_v37  ;;  %v1916_v37 = vsub.f32 %v4150_v8, %v1915_v36 }
 0x235   :  { %1812 = vmatpush.msrb.mxu1 %v3964_v21  ;;  %1789 = vmatpush.msrb.mxu0 %v1622_v32  ;;  %v1853_v21 = vld [vmem:[#allocation2 + $0x2f8] sm:$0xff] }
 0x236   :  { %v4125_v22 = vand.u32 4294901760, %v1853_v21 }
 0x237   :  { %1814 = vmatpush.msrb.mxu1 %v3973_v47  ;;  %1793 = vmatpush.msrb.mxu0 %v1628_v26  ;;  %v4127_v47 = vand.u32 4294901760, %v1852_v31  ;;  %v1843_v26 = vld [vmem:[#allocation2 + $0x2a8] sm:$0xff] }
 0x238   :  { %v4138_v18 = vsub.f32 %v1853_v21, %v4125_v22  ;;  %1855 = vmatpush.msrb.mxu2 %v4125_v22  ;;  %v1840_v21 = vld [vmem:[#allocation2 + $0x290] sm:$0xff] }
 0x239   :  { %1816 = vmatpush.msrb.mxu1 %v3988_v0  ;;  %v1849_v0 = vld [vmem:[#allocation2 + $0x2d8] sm:$0xff] }
 0x23a   :  { %v1897_v16 = vand.u32 4294901760, %v4138_v18  ;;  %1857 = vmatpush.msrb.mxu2 %v4127_v47 }
 0x23b   :  { %1818 = vmatpush.msrb.mxu1 %v4001_v39  ;;  %v4133_v39 = vand.u32 4294901760, %v1849_v0 }
 0x23c   :  { %v1898_v24 = vsub.f32 %v4138_v18, %v1897_v16  ;;  %1859 = vmatpush.msrb.mxu2 %v4129_v54 }
 0x23d   :  { %1820 = vmatpush.msrb.mxu1 %v4008_v45  ;;  %v1847_v45 = vld [vmem:[#allocation2 + $0x2c8] sm:$0xff] }
 0x23e   :  { %v4147_v49 = vand.u32 4294901760, %v1847_v45  ;;  %v1899_v3 = vand.u32 4294901760, %v1898_v24  ;;  %1861 = vmatpush.msrb.mxu2 %v4131_v17  ;;  %v4243_v24 = vand.u32 4294901760, %v1840_v21 }
 0x23f   :  { %1822 = vmatpush.msrb.mxu1 %v4022_v23  ;;  %v4141_v23 = vsub.f32 %v1852_v31, %v4127_v47 }
 0x240   :  { %v4168_v4 = vsub.f32 %v1847_v45, %v4147_v49  ;;  %1900 = vmatpush.msrb.mxu3 %v1899_v3  ;;  %1863 = vmatpush.msrb.mxu2 %v4133_v39  ;;  %v4254_v3 = vand.u32 4294901760, %v1839_v40 }
 0x241   :  { %1824 = vmatpush.msrb.mxu1 %v4032_v1  ;;  %v4153_v1 = vsub.f32 %v1849_v0, %v4133_v39  ;;  %v1903_v63 = vand.u32 4294901760, %v4141_v23 }
 0x242   :  { %v1933_v61 = vand.u32 4294901760, %v4168_v4  ;;  %1865 = vmatpush.msrb.mxu2 %v4135_v43 }
 0x243   :  { %1826 = vmatpush.msrb.mxu1 %v4047_v28  ;;  %v1909_v28 = vand.u32 4294901760, %v4144_v19  ;;  %v1921_v41 = vand.u32 4294901760, %v4153_v1  ;;  %v1904_v11 = vsub.f32 %v4141_v23, %v1903_v63 }
 0x244   :  { %1867 = vmatpush.msrb.mxu2 %v4147_v49 }
 0x245   :  { %1828 = vmatpush.msrb.mxu1 %v4061_v44  ;;  %v1910_v6 = vsub.f32 %v4144_v19, %v1909_v28  ;;  %v1905_v32 = vand.u32 4294901760, %v1904_v11  ;;  %v1922_v60 = vsub.f32 %v4153_v1, %v1921_v41 }
 0x246   :  { %1869 = vmatpush.msrb.mxu2 %v4162_v15 }
 0x247   :  { %1830 = vmatpush.msrb.mxu1 %v4068_v9  ;;  %v1927_v9 = vand.u32 4294901760, %v4156_v42  ;;  %1906 = vmatpush.msrb.mxu3 %v1905_v32  ;;  %v1923_v31 = vand.u32 4294901760, %v1922_v60 }
 0x284   :  { %v1319_v30 = vpop.f32.mrf.mxu0 }
 0x286   :  { %v1358_v58 = vpop.f32.mrf.mxu1 }
 0x288   :  { %v1265_v51 = vpop.f32.mrf.mxu3 }
 0x290   :  { %v1164_v55 = vpop.f32.mrf.mxu2  ;;  %v1464_v34 = vpop.f32.mrf.mxu3 }
 0x291   :  { %v1266_v7 = vadd.f32 %v1265_v51, %v1164_v55  ;;  %v1911_v55 = vand.u32 4294901760, %v1910_v6 }
 0x293   :  { %v1320_v29 = vadd.f32 %v1319_v30, %v1266_v7  ;;  %v4199_v7 = vand.u32 4294901760, %v1845_v10  ;;  %v4201_v30 = vand.u32 4294901760, %v1844_v50  ;;  %1912 = vmatpush.msrb.mxu3 %v1911_v55 }
 0x295   :  { %v1359_v2 = vadd.f32 %v1358_v58, %v1320_v29  ;;  %v1917_v29 = vand.u32 4294901760, %v1916_v37  ;;  %v1928_v58 = vsub.f32 %v4156_v42, %v1927_v9  ;;  %1871 = vmatpush.msrb.mxu2 %v4199_v7 }
 0x297   :  { %v1929_v45 = vand.u32 4294901760, %v1928_v58  ;;  %1918 = vmatpush.msrb.mxu3 %v1917_v29  ;;  %1873 = vmatpush.msrb.mxu2 %v4201_v30 }
 0x298   :  { %v1427_v57 = vpop.f32.mrf.mxu2 }
 0x299   :  { %v1428_v20 = vadd.f32 %v1427_v57, %v1359_v2  ;;  %v4206_v2 = vand.u32 4294901760, %v1843_v26  ;;  %v1841_v57 = vld [vmem:[#allocation2 + $0x298] sm:$0xff]  ;;  %1924 = vmatpush.msrb.mxu3 %v1923_v31 }
 0x29a   :  { %v4231_v0 = vand.u32 4294901760, %v1841_v57 }
 0x29b   :  { %v4116_v48 = vadd.f32 %v1464_v34, %v1428_v20  ;;  %v1939_v34 = vand.u32 4294901760, %v4188_v13  ;;  %v4229_v25 = vsub.f32 %v1843_v26, %v4206_v2  ;;  %1930 = vmatpush.msrb.mxu3 %v1929_v45  ;;  %1875 = vmatpush.msrb.mxu2 %v4206_v2 }
 0x29d   :  { %v1468_v62 = vand.u32 2147483647, %v4116_v48  ;;  %v1467_v35 = vmax.f32 %v4116_v48, 0.0 }
 0x29f   :  { %v1469_v33 = vsub.f32 0.0, %v1468_v62  ;;  %v4213_v62 = vsub.f32 %v1845_v10, %v4199_v7  ;;  %v1957_v10 = vand.u32 4294901760, %v4229_v25 }
 0x2a1   :  { %v1470_v59 = vmul.f32 1.442695, %v1469_v33  ;;  %v4216_v33 = vand.u32 4294901760, %v1842_v12  ;;  %v1945_v38 = vand.u32 4294901760, %v4213_v62  ;;  %v1958_v29 = vsub.f32 %v4229_v25, %v1957_v10 }
 0x2a3   :  { %2923 = vpow2.f32 %v1470_v59  ;;  %v1946_v37 = vsub.f32 %v4213_v62, %v1945_v38  ;;  %1877 = vmatpush.msrb.mxu2 %v4216_v33  ;;  %v1959_v31 = vand.u32 4294901760, %v1958_v29 }
 0x2a5   :  { %v1947_v55 = vand.u32 4294901760, %v1946_v37  ;;  %1879 = vmatpush.msrb.mxu2 %v4231_v0 }
 0x2a7   :  { %1881 = vmatpush.msrb.mxu2 %v4243_v24 }
 0x2a9   :  { %v2924_v27 = vpop.eup %2923  ;;  %1883 = vmatpush.msrb.mxu2 %v4254_v3 }
 0x2aa   :  { %v1472_v56 = vadd.f32 1.0, %v2924_v27  ;;  %v1934_v27 = vsub.f32 %v4168_v4, %v1933_v61 }
 0x2ac   :  { %2925 = vlog2.f32 %v1472_v56  ;;  %v4224_v56 = vsub.f32 %v1844_v50, %v4201_v30  ;;  %v1935_v6 = vand.u32 4294901760, %v1934_v27  ;;  %v4252_v50 = vsub.f32 %v1841_v57, %v4231_v0 }
 0x2ad   :  { %v4272_v57 = vsub.f32 %v1839_v40, %v4254_v3 }
 0x2ae   :  { %1936 = vmatpush.msrb.mxu3 %v1935_v6  ;;  %v1969_v58 = vand.u32 4294901760, %v4252_v50 }
 0x2af   :  { %v1981_v45 = vand.u32 4294901760, %v4272_v57 }
 0x2b1   :  { %v1982_v6 = vsub.f32 %v4272_v57, %v1981_v45 }
 0x2b2   :  { %v2926_v5 = vpop.eup %2925 }
 0x2b3   :  { %v1474_v44 = vmul.f32 0.6931472, %v2926_v5  ;;  %v1940_v5 = vsub.f32 %v4188_v13, %v1939_v34 }
 0x2b5   :  { %v4184_v53 = vadd.f32 %v1474_v44, %v1467_v35  ;;  %v1951_v35 = vand.u32 4294901760, %v4224_v56  ;;  %v4241_v44 = vsub.f32 %v1842_v12, %v4216_v33  ;;  %v1941_v26 = vand.u32 4294901760, %v1940_v5 }
 0x2b7   :  { %v1476_v51 = vmul.f32 %v2927_v52, %v4184_v53  ;;  %v1952_v60 = vsub.f32 %v4224_v56, %v1951_v35  ;;  %v1963_v12 = vand.u32 4294901760, %v4241_v44  ;;  %v4263_v52 = vsub.f32 %v1840_v21, %v4243_v24  ;;  %1942 = vmatpush.msrb.mxu3 %v1941_v26 }
 0x2b9   :  { %v1477_v20 = vsel %vm1106_vm1, %v1476_v51, %v4116_v48  ;;  %v1964_v27 = vsub.f32 %v4241_v44, %v1963_v12  ;;  %v1975_v21 = vand.u32 4294901760, %v4263_v52  ;;  %1948 = vmatpush.msrb.mxu3 %v1947_v55 }
 0x2ba   :  { %v4218_v59 = vand.u32 4294901760, %v1477_v20 }
 0x2bb   :  { %v1965_v40 = vand.u32 4294901760, %v1964_v27  ;;  %v1976_v5 = vsub.f32 %v4263_v52, %v1975_v21 }
 0x2bc   :  { %1633 = vmatmul.f32.vlgmr.msra.gmra.mxu1 %v4218_v59  ;;  %v1528_v46 = vsub.f32 %v1477_v20, %v4218_v59  ;;  %v1953_v20 = vand.u32 4294901760, %v1952_v60 }
 0x2bd   :  { %2051 = vmatpush.msra.mxu1 %v4125_v22  ;;  %v1977_v37 = vand.u32 4294901760, %v1976_v5 }
 0x2be   :  { %1687 = vmatmul.f32.vlgmr.msra.gmra.mxu2 %v1528_v46  ;;  %v1529_v11 = vand.u32 4294901760, %v1528_v46  ;;  %1954 = vmatpush.msrb.mxu3 %v1953_v20  ;;  %v2202_v20 = vld [vmem:[#allocation2 + $0x330] sm:$0xff] }
 0x2bf   :  { %2053 = vmatpush.msra.mxu1 %v4127_v47 }
 0x2c0   :  { %1726 = vmatmul.f32.vlgmr.msra.gmra.mxu3 %v1529_v11  ;;  %v1530_v32 = vsub.f32 %v1528_v46, %v1529_v11  ;;  %v1970_v46 = vsub.f32 %v4252_v50, %v1969_v58 }
 0x2c1   :  { %2055 = vmatpush.msra.mxu1 %v4129_v54  ;;  %1960 = vmatpush.msrb.mxu3 %v1959_v31 }
 0x2c2   :  { %v1531_v51 = vand.u32 4294901760, %v1530_v32  ;;  %v1971_v11 = vand.u32 4294901760, %v1970_v46  ;;  %v1983_v32 = vand.u32 4294901760, %v1982_v6  ;;  %v2201_v46 = vld [vmem:[#allocation2 + $0x328] sm:$0xff] }
 0x2c3   :  { %2057 = vmatpush.msra.mxu1 %v4131_v17  ;;  %1966 = vmatpush.msrb.mxu3 %v1965_v40 }
 0x2c4   :  { %1532 = vmatmul.f32.vlgmr.msra.gmra.mxu0 %v1531_v51  ;;  %1832 = vmatmul.f32.vlgmr.msrb.gmra.mxu1 %v4218_v59 }
 0x2c5   :  { %1998 = vmatpush.msra.mxu0 %v4138_v18  ;;  %2059 = vmatpush.msra.mxu1 %v4133_v39 }
 0x2c6   :  { %1972 = vmatpush.msrb.mxu3 %v1971_v11  ;;  %v2200_v11 = vld [vmem:[#allocation2 + $0x320] sm:$0xff] }
 0x2c7   :  { %2001 = vmatpush.msra.mxu0 %v4141_v23  ;;  %2061 = vmatpush.msra.mxu1 %v4135_v43 }
 0x2c8   :  { %1978 = vmatpush.msrb.mxu3 %v1977_v37 }
 0x2c9   :  { %2004 = vmatpush.msra.mxu0 %v4144_v19  ;;  %2063 = vmatpush.msra.mxu1 %v4147_v49 }
 0x2ca   :  { %1984 = vmatpush.msrb.mxu3 %v1983_v32 }
 0x2cb   :  { %2007 = vmatpush.msra.mxu0 %v4150_v8  ;;  %2065 = vmatpush.msra.mxu1 %v4162_v15  ;;  %v2208_v8 = vld [vmem:[#allocation2 + $0x360] sm:$0xff] }
 0x2cc   :  { %1795 = vmatmul.f32.vlgmr.msrb.gmra.mxu0 %v4218_v59  ;;  %v1838_v59 = vld [vmem:[#allocation2 + $0x280] sm:$0xff] }
 0x2cd   :  { %2010 = vmatpush.msra.mxu0 %v4153_v1  ;;  %2067 = vmatpush.msra.mxu1 %v4199_v7  ;;  %v1884_v26 = vand.u32 4294901760, %v1838_v59  ;;  %v2207_v1 = vld [vmem:[#allocation2 + $0x358] sm:$0xff] }
 0x2cf   :  { %2013 = vmatpush.msra.mxu0 %v4156_v42  ;;  %2069 = vmatpush.msra.mxu1 %v4201_v30  ;;  %v1986_v60 = vsub.f32 %v1838_v59, %v1884_v26  ;;  %v2206_v42 = vld [vmem:[#allocation2 + $0x350] sm:$0xff]  ;;  %v4435_v59 = vand.u32 4294901760, %v2202_v20 }
 0x2d0   :  { %1885 = vmatpush.msrb.mxu2 %v1884_v26 }
 0x2d1   :  { %2016 = vmatpush.msra.mxu0 %v4168_v4  ;;  %2071 = vmatpush.msra.mxu1 %v4206_v2  ;;  %v1987_v51 = vand.u32 4294901760, %v1986_v60 }
 0x2d2   :  { %2092 = vmatpush.msra.mxu2 %v1897_v16 }
 0x2d3   :  { %2019 = vmatpush.msra.mxu0 %v4188_v13  ;;  %2073 = vmatpush.msra.mxu1 %v4216_v33  ;;  %v1988_v55 = vsub.f32 %v1986_v60, %v1987_v51 }
 0x2d4   :  { %2096 = vmatpush.msra.mxu2 %v1903_v63  ;;  %v4372_v63 = vand.u32 4294901760, %v2208_v8 }
 0x2d5   :  { %2022 = vmatpush.msra.mxu0 %v4213_v62  ;;  %2075 = vmatpush.msra.mxu1 %v4231_v0  ;;  %v1989_v29 = vand.u32 4294901760, %v1988_v55  ;;  %v4440_v55 = vand.u32 4294901760, %v2201_v46 }
 0x2d6   :  { %2100 = vmatpush.msra.mxu2 %v1909_v28  ;;  %v4374_v28 = vand.u32 4294901760, %v2207_v1 }
 0x2d7   :  { %2025 = vmatpush.msra.mxu0 %v4224_v56  ;;  %2077 = vmatpush.msra.mxu1 %v4243_v24 }
 0x2d8   :  { %2104 = vmatpush.msra.mxu2 %v1915_v36  ;;  %1990 = vmatpush.msrb.mxu3 %v1989_v29  ;;  %v2205_v36 = vld [vmem:[#allocation2 + $0x348] sm:$0xff]  ;;  %v2199_v29 = vld [vmem:[#allocation2 + $0x318] sm:$0xff] }
 0x2d9   :  { %2028 = vmatpush.msra.mxu0 %v4229_v25  ;;  %2079 = vmatpush.msra.mxu1 %v4254_v3  ;;  %v4388_v13 = vand.u32 4294901760, %v2205_v36 }
 0x2da   :  { %2159 = vmatpush.msra.mxu3 %v4125_v22  ;;  %2108 = vmatpush.msra.mxu2 %v1921_v41 }
 0x2db   :  { %2031 = vmatpush.msra.mxu0 %v4241_v44  ;;  %2081 = vmatpush.msra.mxu1 %v1884_v26 }
 0x2dc   :  { %2161 = vmatpush.msra.mxu3 %v4127_v47  ;;  %2112 = vmatpush.msra.mxu2 %v1927_v9 }
 0x2dd   :  { %2034 = vmatpush.msra.mxu0 %v4252_v50 }
 0x2de   :  { %2163 = vmatpush.msra.mxu3 %v4129_v54  ;;  %2116 = vmatpush.msra.mxu2 %v1933_v61  ;;  %v4391_v61 = vsub.f32 %v2208_v8, %v4372_v63 }
 0x2df   :  { %2037 = vmatpush.msra.mxu0 %v4263_v52 }
 0x2e0   :  { %2165 = vmatpush.msra.mxu3 %v4131_v17  ;;  %2120 = vmatpush.msra.mxu2 %v1939_v34  ;;  %v2211_v17 = vld [vmem:[#allocation2 + $0x378] sm:$0xff]  ;;  %v2273_v25 = vand.u32 4294901760, %v4391_v61 }
 0x2e1   :  { %2040 = vmatpush.msra.mxu0 %v4272_v57  ;;  %v4366_v23 = vand.u32 4294901760, %v2211_v17  ;;  %v2203_v57 = vld [vmem:[#allocation2 + $0x338] sm:$0xff] }
 0x2e2   :  { %2167 = vmatpush.msra.mxu3 %v4133_v39  ;;  %2124 = vmatpush.msra.mxu2 %v1945_v38  ;;  %v2210_v39 = vld [vmem:[#allocation2 + $0x370] sm:$0xff]  ;;  %v2274_v52 = vsub.f32 %v4391_v61, %v2273_v25  ;;  %v4433_v32 = vand.u32 4294901760, %v2203_v57 }
 0x2e3   :  { %2043 = vmatpush.msra.mxu0 %v1986_v60  ;;  %v4368_v19 = vand.u32 4294901760, %v2210_v39  ;;  %v4379_v41 = vsub.f32 %v2211_v17, %v4366_v23  ;;  %v4450_v17 = vand.u32 4294901760, %v2200_v11 }
 0x2e4   :  { %2169 = vmatpush.msra.mxu3 %v4135_v43  ;;  %2128 = vmatpush.msra.mxu2 %v1951_v35  ;;  %v2209_v43 = vld [vmem:[#allocation2 + $0x368] sm:$0xff]  ;;  %v4406_v35 = vsub.f32 %v2205_v36, %v4388_v13  ;;  %v2275_v60 = vand.u32 4294901760, %v2274_v52 }
 0x2e5   :  { %v4382_v4 = vsub.f32 %v2210_v39, %v4368_v19  ;;  %2213 = vmatpush.msrb.mxu0 %v4366_v23  ;;  %v2255_v62 = vand.u32 4294901760, %v4379_v41 }
 0x2e6   :  { %2171 = vmatpush.msra.mxu3 %v4147_v49  ;;  %2132 = vmatpush.msra.mxu2 %v1957_v10  ;;  %v4370_v49 = vand.u32 4294901760, %v2209_v43  ;;  %v2291_v5 = vand.u32 4294901760, %v4406_v35 }
 0x2e7   :  { %2215 = vmatpush.msrb.mxu0 %v4368_v19 }
 0x2e8   :  { %2173 = vmatpush.msra.mxu3 %v4162_v15  ;;  %2136 = vmatpush.msra.mxu2 %v1963_v12  ;;  %v4376_v15 = vand.u32 4294901760, %v2206_v42  ;;  %v4385_v9 = vsub.f32 %v2209_v43, %v4370_v49  ;;  %v2292_v43 = vsub.f32 %v4406_v35, %v2291_v5 }
 0x2e9   :  { %2217 = vmatpush.msrb.mxu0 %v4370_v49 }
 0x2ea   :  { %2175 = vmatpush.msra.mxu3 %v4199_v7  ;;  %2140 = vmatpush.msra.mxu2 %v1969_v58  ;;  %v4394_v7 = vsub.f32 %v2207_v1, %v4374_v28  ;;  %v2267_v56 = vand.u32 4294901760, %v4385_v9 }
 0x2eb   :  { %2219 = vmatpush.msrb.mxu0 %v4372_v63 }
 0x2ec   :  { %2177 = vmatpush.msra.mxu3 %v4201_v30  ;;  %2144 = vmatpush.msra.mxu2 %v1975_v21  ;;  %v4397_v30 = vsub.f32 %v2206_v42, %v4376_v15  ;;  %v2268_v50 = vsub.f32 %v4385_v9, %v2267_v56  ;;  %v4460_v42 = vsub.f32 %v2201_v46, %v4440_v55 }
 0x2ed   :  { %2221 = vmatpush.msrb.mxu0 %v4374_v28 }
 0x2ee   :  { %2179 = vmatpush.msra.mxu3 %v4206_v2  ;;  %2148 = vmatpush.msra.mxu2 %v1981_v45  ;;  %v2204_v2 = vld [vmem:[#allocation2 + $0x340] sm:$0xff]  ;;  %v2285_v58 = vand.u32 4294901760, %v4397_v30  ;;  %v2269_v6 = vand.u32 4294901760, %v2268_v50  ;;  %v2293_v50 = vand.u32 4294901760, %v2292_v43  ;;  %v2315_v52 = vand.u32 4294901760, %v4460_v42 }
 0x2ef   :  { %2223 = vmatpush.msrb.mxu0 %v4376_v15 }
 0x2f0   :  { %2181 = vmatpush.msra.mxu3 %v4216_v33  ;;  %2152 = vmatpush.msra.mxu2 %v1987_v51  ;;  %v2261_v33 = vand.u32 4294901760, %v4382_v4  ;;  %v2286_v51 = vsub.f32 %v4397_v30, %v2285_v58 }
 0x2f1   :  { %2225 = vmatpush.msrb.mxu0 %v4388_v13 }
 0x2f2   :  { %2183 = vmatpush.msra.mxu3 %v4231_v0  ;;  %v2279_v0 = vand.u32 4294901760, %v4394_v7  ;;  %v2262_v10 = vsub.f32 %v4382_v4, %v2261_v33 }
 0x2f4   :  { %2185 = vmatpush.msra.mxu3 %v4243_v24  ;;  %v2256_v24 = vsub.f32 %v4379_v41, %v2255_v62  ;;  %v2263_v31 = vand.u32 4294901760, %v2262_v10  ;;  %v2280_v40 = vsub.f32 %v4394_v7, %v2279_v0 }
 0x2f6   :  { %2187 = vmatpush.msra.mxu3 %v4254_v3  ;;  %v4418_v3 = vand.u32 4294901760, %v2204_v2  ;;  %v2257_v21 = vand.u32 4294901760, %v2256_v24  ;;  %v2281_v8 = vand.u32 4294901760, %v2280_v40 }
 0x2f8   :  { %2189 = vmatpush.msra.mxu3 %v1884_v26  ;;  %2258 = vmatpush.msrb.mxu1 %v2257_v21  ;;  %v4430_v37 = vsub.f32 %v2204_v2, %v4418_v3  ;;  %v2287_v2 = vand.u32 4294901760, %v2286_v51 }
 0x2f9   :  { %2227 = vmatpush.msrb.mxu0 %v4418_v3 }
 0x2fa   :  { %2264 = vmatpush.msrb.mxu1 %v2263_v31 }
 0x2fb   :  { %2229 = vmatpush.msrb.mxu0 %v4433_v32 }
 0x2fc   :  { %2270 = vmatpush.msrb.mxu1 %v2269_v6 }
 0x2fd   :  { %2231 = vmatpush.msrb.mxu0 %v4435_v59 }
 0x2fe   :  { %2276 = vmatpush.msrb.mxu1 %v2275_v60 }
 0x2ff   :  { %2233 = vmatpush.msrb.mxu0 %v4440_v55 }
 0x300   :  { %2282 = vmatpush.msrb.mxu1 %v2281_v8 }
 0x301   :  { %2235 = vmatpush.msrb.mxu0 %v4450_v17 }
 0x302   :  { %2288 = vmatpush.msrb.mxu1 %v2287_v2 }
 0x304   :  { %2294 = vmatpush.msrb.mxu1 %v2293_v50 }
 0x339   :  { %v1634_v22 = vpop.f32.mrf.mxu1 }
 0x341   :  { %v1533_v47 = vpop.f32.mrf.mxu0  ;;  %v1688_v18 = vpop.f32.mrf.mxu2 }
 0x342   :  { %v1635_v54 = vadd.f32 %v1634_v22, %v1533_v47  ;;  %v1833_v27 = vpop.f32.mrf.mxu1  ;;  %v2297_v22 = vand.u32 4294901760, %v4430_v37  ;;  %v4444_v47 = vsub.f32 %v2203_v57, %v4433_v32 }
 0x343   :  { %v1727_v34 = vpop.f32.mrf.mxu3 }
 0x344   :  { %v1689_v16 = vadd.f32 %v1688_v18, %v1635_v54  ;;  %v4448_v54 = vsub.f32 %v2202_v20, %v4435_v59  ;;  %v2198_v18 = vld [vmem:[#allocation2 + $0x310] sm:$0xff]  ;;  %v2303_v1 = vand.u32 4294901760, %v4444_v47 }
 0x345   :  { %v4474_v24 = vand.u32 4294901760, %v2198_v18 }
 0x346   :  { %v1728_v38 = vadd.f32 %v1727_v34, %v1689_v16  ;;  %v4462_v16 = vand.u32 4294901760, %v2199_v29  ;;  %v2298_v34 = vsub.f32 %v4430_v37, %v2297_v22 }
 0x347   :  { %v4492_v46 = vsub.f32 %v2198_v18, %v4474_v24 }
 0x348   :  { %v4483_v57 = vsub.f32 %v2199_v29, %v4462_v16  ;;  %2237 = vmatpush.msrb.mxu0 %v4462_v16 }
 0x349   :  { %v1796_v44 = vpop.f32.mrf.mxu0  ;;  %v2333_v51 = vand.u32 4294901760, %v4492_v46 }
 0x34a   :  { %v1797_v12 = vadd.f32 %v1796_v44, %v1728_v38  ;;  %v2309_v38 = vand.u32 4294901760, %v4448_v54  ;;  %v4472_v44 = vsub.f32 %v2200_v11, %v4450_v17  ;;  %v2316_v11 = vsub.f32 %v4460_v42, %v2315_v52  ;;  %2239 = vmatpush.msrb.mxu0 %v4474_v24 }
 0x34b   :  { %v2327_v6 = vand.u32 4294901760, %v4483_v57  ;;  %v2334_v8 = vsub.f32 %v4492_v46, %v2333_v51 }
 0x34c   :  { %v1834_v45 = vadd.f32 %v1833_v27, %v1797_v12  ;;  %v2304_v12 = vsub.f32 %v4444_v47, %v2303_v1  ;;  %v2299_v27 = vand.u32 4294901760, %v2298_v34  ;;  %v2310_v21 = vsub.f32 %v4448_v54, %v2309_v38 }
 0x34d   :  { %v2321_v31 = vand.u32 4294901760, %v4472_v44  ;;  %v2317_v29 = vand.u32 4294901760, %v2316_v11  ;;  %v2328_v43 = vsub.f32 %v4483_v57, %v2327_v6  ;;  %v2335_v2 = vand.u32 4294901760, %v2334_v8 }
 0x34e   :  { %v1836_v26 = vmax.f32 %v1834_v45, 0.0  ;;  %v2305_v40 = vand.u32 4294901760, %v2304_v12  ;;  %2300 = vmatpush.msrb.mxu1 %v2299_v27 }
 0x34f   :  { %v2322_v60 = vsub.f32 %v4472_v44, %v2321_v31 }
 0x350   :  { %v4452_v39 = vand.u32 4294901760, %v1836_v26  ;;  %2306 = vmatpush.msrb.mxu1 %v2305_v40 }
 0x351   :  { %v2323_v18 = vand.u32 4294901760, %v2322_v60  ;;  %v2561_v60 = vld [vmem:[#allocation2 + $0x3b0] sm:$0xff] }
 0x352   :  { %v1887_v36 = vsub.f32 %v1836_v26, %v4452_v39  ;;  %1992 = vmatmul.f32.vlgmr.msrb.gmra.mxu3 %v4452_v39  ;;  %v2311_v26 = vand.u32 4294901760, %v2310_v21 }
 0x353   :  { %2409 = vmatpush.msrb.mxu3 %v4366_v23 }
 0x354   :  { %2046 = vmatmul.f32.vlgmr.msra.gmra.mxu0 %v1887_v36  ;;  %v1888_v10 = vand.u32 4294901760, %v1887_v36  ;;  %2312 = vmatpush.msrb.mxu1 %v2311_v26 }
 0x355   :  { %2411 = vmatpush.msrb.mxu3 %v4368_v19 }
 0x356   :  { %2085 = vmatmul.f32.vlgmr.msra.gmra.mxu1 %v1888_v10  ;;  %v1889_v20 = vsub.f32 %v1887_v36, %v1888_v10  ;;  %v2329_v36 = vand.u32 4294901760, %v2328_v43  ;;  %v2196_v10 = vld [vmem:[#allocation2 + $0x300] sm:$0xff] }
 0x357   :  { %2413 = vmatpush.msrb.mxu3 %v4370_v49  ;;  %2318 = vmatpush.msrb.mxu1 %v2317_v29  ;;  %v2242_v12 = vand.u32 4294901760, %v2196_v10 }
 0x358   :  { %v1890_v45 = vand.u32 4294901760, %v1889_v20 }
 0x359   :  { %2415 = vmatpush.msrb.mxu3 %v4372_v63  ;;  %2324 = vmatpush.msrb.mxu1 %v2323_v18  ;;  %v2344_v27 = vsub.f32 %v2196_v10, %v2242_v12  ;;  %v2560_v18 = vld [vmem:[#allocation2 + $0x3a8] sm:$0xff] }
 0x35a   :  { %1891 = vmatmul.f32.vlgmr.msrb.gmra.mxu2 %v1890_v45  ;;  %2191 = vmatmul.f32.vlgmr.msra.gmra.mxu3 %v4452_v39 }
 0x35b   :  { %2356 = vmatpush.msrb.mxu2 %v4379_v41  ;;  %2417 = vmatpush.msrb.mxu3 %v4374_v28  ;;  %v2345_v45 = vand.u32 4294901760, %v2344_v27 }
 0x35c   :  { %2330 = vmatpush.msrb.mxu1 %v2329_v36 }
 0x35d   :  { %2359 = vmatpush.msrb.mxu2 %v4382_v4  ;;  %2419 = vmatpush.msrb.mxu3 %v4376_v15  ;;  %v2346_v11 = vsub.f32 %v2344_v27, %v2345_v45 }
 0x35e   :  { %2336 = vmatpush.msrb.mxu1 %v2335_v2 }
 0x35f   :  { %2362 = vmatpush.msrb.mxu2 %v4385_v9  ;;  %2421 = vmatpush.msrb.mxu3 %v4388_v13  ;;  %v2347_v26 = vand.u32 4294901760, %v2346_v11  ;;  %v2567_v9 = vld [vmem:[#allocation2 + $0x3e0] sm:$0xff]  ;;  %v2558_v11 = vld [vmem:[#allocation2 + $0x398] sm:$0xff] }
 0x361   :  { %2365 = vmatpush.msrb.mxu2 %v4391_v61  ;;  %2423 = vmatpush.msrb.mxu3 %v4418_v3  ;;  %v2565_v61 = vld [vmem:[#allocation2 + $0x3d0] sm:$0xff] }
 0x362   :  { %2154 = vmatmul.f32.vlgmr.msra.gmra.mxu2 %v4452_v39  ;;  %v2197_v39 = vld [vmem:[#allocation2 + $0x308] sm:$0xff] }
 0x363   :  { %2368 = vmatpush.msrb.mxu2 %v4394_v7  ;;  %2425 = vmatpush.msrb.mxu3 %v4433_v32  ;;  %v2240_v34 = vand.u32 4294901760, %v2197_v39 }
 0x365   :  { %2371 = vmatpush.msrb.mxu2 %v4397_v30  ;;  %2427 = vmatpush.msrb.mxu3 %v4435_v59  ;;  %v2338_v50 = vsub.f32 %v2197_v39, %v2240_v34  ;;  %v4588_v30 = vand.u32 4294901760, %v2567_v9  ;;  %v2559_v39 = vld [vmem:[#allocation2 + $0x3a0] sm:$0xff] }
 0x366   :  { %2241 = vmatpush.msrb.mxu0 %v2240_v34 }
 0x367   :  { %2374 = vmatpush.msrb.mxu2 %v4406_v35  ;;  %2429 = vmatpush.msrb.mxu3 %v4440_v55  ;;  %v2339_v20 = vand.u32 4294901760, %v2338_v50 }
 0x368   :  { %2243 = vmatpush.msrb.mxu0 %v2242_v12 }
 0x369   :  { %2377 = vmatpush.msrb.mxu2 %v4430_v37  ;;  %2431 = vmatpush.msrb.mxu3 %v4450_v17  ;;  %v2340_v21 = vsub.f32 %v2338_v50, %v2339_v20  ;;  %v4607_v37 = vsub.f32 %v2567_v9, %v4588_v30  ;;  %v2557_v9 = vld [vmem:[#allocation2 + $0x390] sm:$0xff] }
 0x36a   :  { %2450 = vmatpush.msra.mxu0 %v2255_v62 }
 0x36b   :  { %2380 = vmatpush.msrb.mxu2 %v4444_v47  ;;  %2433 = vmatpush.msrb.mxu3 %v4462_v16  ;;  %v2341_v40 = vand.u32 4294901760, %v2340_v21 }
 0x36c   :  { %2454 = vmatpush.msra.mxu0 %v2261_v33  ;;  %v4592_v33 = vand.u32 4294901760, %v2565_v61 }
 0x36d   :  { %2383 = vmatpush.msrb.mxu2 %v4448_v54  ;;  %2435 = vmatpush.msrb.mxu3 %v4474_v24  ;;  %v2563_v54 = vld [vmem:[#allocation2 + $0x3c0] sm:$0xff] }
 0x36e   :  { %2458 = vmatpush.msra.mxu0 %v2267_v56  ;;  %2342 = vmatpush.msrb.mxu1 %v2341_v40  ;;  %v2564_v56 = vld [vmem:[#allocation2 + $0x3c8] sm:$0xff]  ;;  %v4656_v40 = vand.u32 4294901760, %v2560_v18 }
 0x36f   :  { %2386 = vmatpush.msrb.mxu2 %v4460_v42  ;;  %2437 = vmatpush.msrb.mxu3 %v2240_v34 }
 0x370   :  { %2462 = vmatpush.msra.mxu0 %v2273_v25  ;;  %2348 = vmatpush.msrb.mxu1 %v2347_v26 }
 0x371   :  { %2389 = vmatpush.msrb.mxu2 %v4472_v44  ;;  %2439 = vmatpush.msrb.mxu3 %v2242_v12 }
 0x372   :  { %2517 = vmatpush.msra.mxu1 %v4366_v23  ;;  %2466 = vmatpush.msra.mxu0 %v2279_v0  ;;  %v2570_v23 = vld [vmem:[#allocation2 + $0x3f8] sm:$0xff] }
 0x373   :  { %2392 = vmatpush.msrb.mxu2 %v4483_v57 }
 0x374   :  { %2519 = vmatpush.msra.mxu1 %v4368_v19  ;;  %2470 = vmatpush.msra.mxu0 %v2285_v58  ;;  %v2569_v19 = vld [vmem:[#allocation2 + $0x3f0] sm:$0xff]  ;;  %v4604_v58 = vand.u32 4294901760, %v2564_v56 }
 0x375   :  { %2395 = vmatpush.msrb.mxu2 %v4492_v46  ;;  %v4584_v41 = vand.u32 4294901760, %v2569_v19  ;;  %v4638_v46 = vand.u32 4294901760, %v2563_v54 }
 0x376   :  { %2521 = vmatpush.msra.mxu1 %v4370_v49  ;;  %2474 = vmatpush.msra.mxu0 %v2291_v5  ;;  %v2568_v49 = vld [vmem:[#allocation2 + $0x3e8] sm:$0xff]  ;;  %v4622_v42 = vsub.f32 %v2564_v56, %v4604_v58  ;;  %v4678_v56 = vand.u32 4294901760, %v2558_v11 }
 0x377   :  { %2398 = vmatpush.msrb.mxu2 %v2338_v50  ;;  %v4586_v4 = vand.u32 4294901760, %v2568_v49  ;;  %v4598_v35 = vsub.f32 %v2569_v19, %v4584_v41  ;;  %v4646_v50 = vsub.f32 %v2563_v54, %v4638_v46  ;;  %v2556_v54 = vld [vmem:[#allocation2 + $0x388] sm:$0xff] }
 0x378   :  { %2523 = vmatpush.msra.mxu1 %v4372_v63  ;;  %2478 = vmatpush.msra.mxu0 %v2297_v22  ;;  %v2650_v2 = vand.u32 4294901760, %v4622_v42 }
 0x379   :  { %2401 = vmatpush.msrb.mxu2 %v2344_v27  ;;  %v2620_v22 = vand.u32 4294901760, %v4598_v35  ;;  %v2656_v26 = vand.u32 4294901760, %v4646_v50 }
 0x37a   :  { %2525 = vmatpush.msra.mxu1 %v4374_v28  ;;  %2482 = vmatpush.msra.mxu0 %v2303_v1 }
 0x37b   :  { %v2621_v44 = vsub.f32 %v4598_v35, %v2620_v22 }
 0x37c   :  { %2527 = vmatpush.msra.mxu1 %v4376_v15  ;;  %2486 = vmatpush.msra.mxu0 %v2309_v38  ;;  %v4582_v15 = vand.u32 4294901760, %v2570_v23 }
 0x37d   :  { %v2622_v43 = vand.u32 4294901760, %v2621_v44 }
 0x37e   :  { %2529 = vmatpush.msra.mxu1 %v4388_v13  ;;  %2490 = vmatpush.msra.mxu0 %v2315_v52  ;;  %v2566_v13 = vld [vmem:[#allocation2 + $0x3d8] sm:$0xff]  ;;  %v4595_v0 = vsub.f32 %v2570_v23, %v4582_v15 }
 0x37f   :  { %v4590_v62 = vand.u32 4294901760, %v2566_v13  ;;  %2572 = vmatpush.msra.mxu2 %v4582_v15 }
 0x380   :  { %2531 = vmatpush.msra.mxu1 %v4418_v3  ;;  %2494 = vmatpush.msra.mxu0 %v2321_v31  ;;  %v4601_v3 = vsub.f32 %v2568_v49, %v4586_v4  ;;  %v4666_v49 = vand.u32 4294901760, %v2559_v39 }
 0x381   :  { %2574 = vmatpush.msra.mxu2 %v4584_v41 }
 0x382   :  { %2533 = vmatpush.msra.mxu1 %v4433_v32  ;;  %2498 = vmatpush.msra.mxu0 %v2327_v6  ;;  %v4610_v32 = vsub.f32 %v2566_v13, %v4590_v62  ;;  %v2626_v47 = vand.u32 4294901760, %v4601_v3  ;;  %v2562_v6 = vld [vmem:[#allocation2 + $0x3b8] sm:$0xff]  ;;  %v4688_v44 = vsub.f32 %v2559_v39, %v4666_v49 }
 0x383   :  { %2576 = vmatpush.msra.mxu2 %v4586_v4 }
 0x384   :  { %2535 = vmatpush.msra.mxu1 %v4435_v59  ;;  %2502 = vmatpush.msra.mxu0 %v2333_v51  ;;  %v4613_v59 = vsub.f32 %v2565_v61, %v4592_v33  ;;  %v2638_v1 = vand.u32 4294901760, %v4610_v32 }
 0x385   :  { %2578 = vmatpush.msra.mxu2 %v4588_v30 }
 0x386   :  { %2537 = vmatpush.msra.mxu1 %v4440_v55  ;;  %2506 = vmatpush.msra.mxu0 %v2339_v20  ;;  %v2614_v55 = vand.u32 4294901760, %v4595_v0  ;;  %v2644_v31 = vand.u32 4294901760, %v4613_v59  ;;  %v2639_v36 = vsub.f32 %v4610_v32, %v2638_v1  ;;  %v4651_v20 = vand.u32 4294901760, %v2561_v60 }
 0x387   :  { %2580 = vmatpush.msra.mxu2 %v4590_v62 }
 0x388   :  { %2539 = vmatpush.msra.mxu1 %v4450_v17  ;;  %2510 = vmatpush.msra.mxu0 %v2345_v45  ;;  %v2632_v17 = vand.u32 4294901760, %v4607_v37  ;;  %v2615_v38 = vsub.f32 %v4595_v0, %v2614_v55  ;;  %v2645_v45 = vsub.f32 %v4613_v59, %v2644_v31  ;;  %v4664_v19 = vsub.f32 %v2561_v60, %v4651_v20 }
 0x389   :  { %2582 = vmatpush.msra.mxu2 %v4592_v33  ;;  %v2640_v13 = vand.u32 4294901760, %v2639_v36  ;;  %v2680_v36 = vand.u32 4294901760, %v4688_v44 }
 0x38a   :  { %2541 = vmatpush.msra.mxu1 %v4462_v16  ;;  %v2633_v57 = vsub.f32 %v4607_v37, %v2632_v17  ;;  %v2616_v29 = vand.u32 4294901760, %v2615_v38  ;;  %v2668_v38 = vand.u32 4294901760, %v4664_v19 }
 0x38b   :  { %2584 = vmatpush.msra.mxu2 %v4604_v58 }
 0x38c   :  { %2543 = vmatpush.msra.mxu1 %v4474_v24  ;;  %v2627_v24 = vsub.f32 %v4601_v3, %v2626_v47  ;;  %2617 = vmatpush.msra.mxu3 %v2616_v29  ;;  %v2634_v21 = vand.u32 4294901760, %v2633_v57  ;;  %v4701_v29 = vand.u32 4294901760, %v2556_v54 }
 0x38d   :  { %2586 = vmatpush.msra.mxu2 %v4638_v46 }
 0x38e   :  { %2545 = vmatpush.msra.mxu1 %v2240_v34  ;;  %v2628_v10 = vand.u32 4294901760, %v2627_v24  ;;  %2623 = vmatpush.msra.mxu3 %v2622_v43  ;;  %v4690_v24 = vand.u32 4294901760, %v2557_v9 }
 0x390   :  { %2547 = vmatpush.msra.mxu1 %v2242_v12  ;;  %v4649_v12 = vand.u32 4294901760, %v2562_v6  ;;  %2629 = vmatpush.msra.mxu3 %v2628_v10  ;;  %v4710_v39 = vsub.f32 %v2557_v9, %v4690_v24 }
 0x392   :  { %v4660_v23 = vsub.f32 %v2562_v6, %v4649_v12  ;;  %2635 = vmatpush.msra.mxu3 %v2634_v21  ;;  %2588 = vmatpush.msra.mxu2 %v4649_v12  ;;  %v2692_v9 = vand.u32 4294901760, %v4710_v39 }
 0x394   :  { %v2662_v61 = vand.u32 4294901760, %v4660_v23  ;;  %2641 = vmatpush.msra.mxu3 %v2640_v13  ;;  %2590 = vmatpush.msra.mxu2 %v4651_v20 }
 0x396   :  { %v2663_v6 = vsub.f32 %v4660_v23, %v2662_v61  ;;  %2592 = vmatpush.msra.mxu2 %v4656_v40 }
 0x398   :  { %v2664_v10 = vand.u32 4294901760, %v2663_v6  ;;  %2594 = vmatpush.msra.mxu2 %v4666_v49 }
 0x39a   :  { %2596 = vmatpush.msra.mxu2 %v4678_v56 }
 0x39c   :  { %2598 = vmatpush.msra.mxu2 %v4690_v24 }
 0x39e   :  { %2600 = vmatpush.msra.mxu2 %v4701_v29 }
 0x3d1   :  { %v2047_v25 = vpop.f32.mrf.mxu0 }
 0x3d3   :  { %v2086_v16 = vpop.f32.mrf.mxu1 }
 0x3d5   :  { %v1993_v63 = vpop.f32.mrf.mxu3 }
 0x3dd   :  { %v1892_v28 = vpop.f32.mrf.mxu2  ;;  %v2192_v34 = vpop.f32.mrf.mxu3 }
 0x3de   :  { %v1994_v7 = vadd.f32 %v1993_v63, %v1892_v28  ;;  %v2651_v28 = vsub.f32 %v4622_v42, %v2650_v2 }
 0x3e0   :  { %v2048_v5 = vadd.f32 %v2047_v25, %v1994_v7  ;;  %v4676_v7 = vsub.f32 %v2560_v18, %v4656_v40  ;;  %v2652_v57 = vand.u32 4294901760, %v2651_v28  ;;  %v2681_v28 = vsub.f32 %v4688_v44, %v2680_v36 }
 0x3e2   :  { %v2087_v52 = vadd.f32 %v2086_v16, %v2048_v5  ;;  %v2646_v5 = vand.u32 4294901760, %v2645_v45  ;;  %v2657_v16 = vsub.f32 %v4646_v50, %v2656_v26  ;;  %v2674_v60 = vand.u32 4294901760, %v4676_v7 }
 0x3e3   :  { %v4719_v45 = vsub.f32 %v2556_v54, %v4701_v29  ;;  %v2682_v54 = vand.u32 4294901760, %v2681_v28 }
 0x3e4   :  { %2647 = vmatpush.msra.mxu3 %v2646_v5  ;;  %v2658_v18 = vand.u32 4294901760, %v2657_v16  ;;  %v2693_v16 = vsub.f32 %v4710_v39, %v2692_v9 }
 0x3e5   :  { %v2155_v51 = vpop.f32.mrf.mxu2  ;;  %v2698_v5 = vand.u32 4294901760, %v4719_v45 }
 0x3e6   :  { %v2156_v8 = vadd.f32 %v2155_v51, %v2087_v52  ;;  %v4699_v51 = vsub.f32 %v2558_v11, %v4678_v56  ;;  %2653 = vmatpush.msra.mxu3 %v2652_v57  ;;  %v2694_v6 = vand.u32 4294901760, %v2693_v16 }
 0x3e7   :  { %v2699_v57 = vsub.f32 %v4719_v45, %v2698_v5 }
 0x3e8   :  { %v2193_v27 = vadd.f32 %v2192_v34, %v2156_v8  ;;  %v2669_v8 = vsub.f32 %v4664_v19, %v2668_v38  ;;  %v2686_v21 = vand.u32 4294901760, %v4699_v51  ;;  %2659 = vmatpush.msra.mxu3 %v2658_v18 }
 0x3ea   :  { %v4668_v63 = vand.u32 4294901760, %v2193_v27  ;;  %v2670_v11 = vand.u32 4294901760, %v2669_v8  ;;  %2665 = vmatpush.msra.mxu3 %v2664_v10 }
 0x3ec   :  { %v2245_v25 = vsub.f32 %v2193_v27, %v4668_v63  ;;  %2350 = vmatmul.f32.vlgmr.msrb.gmra.mxu1 %v4668_v63  ;;  %v2675_v27 = vsub.f32 %v4676_v7, %v2674_v60  ;;  %2671 = vmatpush.msra.mxu3 %v2670_v11 }
 0x3ed   :  { %2768 = vmatpush.msrb.mxu1 %v4582_v15 }
 0x3ee   :  { %2404 = vmatmul.f32.vlgmr.msrb.gmra.mxu2 %v2245_v25  ;;  %v2246_v52 = vand.u32 4294901760, %v2245_v25  ;;  %v2676_v13 = vand.u32 4294901760, %v2675_v27 }
 0x3ef   :  { %2770 = vmatpush.msrb.mxu1 %v4584_v41 }
 0x3f0   :  { %2443 = vmatmul.f32.vlgmr.msrb.gmra.mxu3 %v2246_v52  ;;  %v2247_v43 = vsub.f32 %v2245_v25, %v2246_v52  ;;  %v2687_v25 = vsub.f32 %v4699_v51, %v2686_v21 }
 0x3f1   :  { %2772 = vmatpush.msrb.mxu1 %v4586_v4  ;;  %2677 = vmatpush.msra.mxu3 %v2676_v13 }
 0x3f2   :  { %v2248_v34 = vand.u32 4294901760, %v2247_v43  ;;  %v2688_v52 = vand.u32 4294901760, %v2687_v25  ;;  %v2700_v43 = vand.u32 4294901760, %v2699_v57 }
 0x3f3   :  { %2774 = vmatpush.msrb.mxu1 %v4588_v30  ;;  %2683 = vmatpush.msra.mxu3 %v2682_v54 }
 0x3f4   :  { %2249 = vmatmul.f32.vlgmr.msrb.gmra.mxu0 %v2248_v34  ;;  %2549 = vmatmul.f32.vlgmr.msra.gmra.mxu1 %v4668_v63 }
 0x3f5   :  { %2715 = vmatpush.msrb.mxu0 %v4595_v0  ;;  %2776 = vmatpush.msrb.mxu1 %v4590_v62 }
 0x3f6   :  { %2689 = vmatpush.msra.mxu3 %v2688_v52 }
 0x3f7   :  { %2718 = vmatpush.msrb.mxu0 %v4598_v35  ;;  %2778 = vmatpush.msrb.mxu1 %v4592_v33 }
 0x3f8   :  { %2695 = vmatpush.msra.mxu3 %v2694_v6 }
 0x3f9   :  { %2721 = vmatpush.msrb.mxu0 %v4601_v3  ;;  %2780 = vmatpush.msrb.mxu1 %v4604_v58 }
 0x3fa   :  { %2701 = vmatpush.msra.mxu3 %v2700_v43 }
 0x3fb   :  { %2724 = vmatpush.msrb.mxu0 %v4607_v37  ;;  %2782 = vmatpush.msrb.mxu1 %v4638_v46 }
 0x3fc   :  { %2512 = vmatmul.f32.vlgmr.msra.gmra.mxu0 %v4668_v63  ;;  %v2555_v63 = vld [vmem:[#allocation2 + $0x380] sm:$0xff] }
 0x3fd   :  { %2727 = vmatpush.msrb.mxu0 %v4610_v32  ;;  %2784 = vmatpush.msrb.mxu1 %v4649_v12  ;;  %v2601_v18 = vand.u32 4294901760, %v2555_v63 }
 0x3ff   :  { %2730 = vmatpush.msrb.mxu0 %v4613_v59  ;;  %2786 = vmatpush.msrb.mxu1 %v4651_v20  ;;  %v2703_v8 = vsub.f32 %v2555_v63, %v2601_v18 }
 0x400   :  { %2602 = vmatpush.msra.mxu2 %v2601_v18 }
 0x401   :  { %2733 = vmatpush.msrb.mxu0 %v4622_v42  ;;  %2788 = vmatpush.msrb.mxu1 %v4656_v40  ;;  %v2704_v34 = vand.u32 4294901760, %v2703_v8 }
 0x402   :  { %2809 = vmatpush.msrb.mxu2 %v2614_v55 }
 0x403   :  { %2736 = vmatpush.msrb.mxu0 %v4646_v50  ;;  %2790 = vmatpush.msrb.mxu1 %v4666_v49  ;;  %v2705_v10 = vsub.f32 %v2703_v8, %v2704_v34 }
 0x404   :  { %2813 = vmatpush.msrb.mxu2 %v2620_v22 }
 0x405   :  { %2739 = vmatpush.msrb.mxu0 %v4660_v23  ;;  %2792 = vmatpush.msrb.mxu1 %v4678_v56  ;;  %v2706_v27 = vand.u32 4294901760, %v2705_v10 }
 0x406   :  { %2817 = vmatpush.msrb.mxu2 %v2626_v47 }
 0x407   :  { %2742 = vmatpush.msrb.mxu0 %v4664_v19  ;;  %2794 = vmatpush.msrb.mxu1 %v4690_v24 }
 0x408   :  { %2821 = vmatpush.msrb.mxu2 %v2632_v17  ;;  %2707 = vmatpush.msra.mxu3 %v2706_v27 }
 0x409   :  { %2745 = vmatpush.msrb.mxu0 %v4676_v7  ;;  %2796 = vmatpush.msrb.mxu1 %v4701_v29 }
 0x40a   :  { %2876 = vmatpush.msrb.mxu3 %v4582_v15  ;;  %2825 = vmatpush.msrb.mxu2 %v2638_v1 }
 0x40b   :  { %2748 = vmatpush.msrb.mxu0 %v4688_v44  ;;  %2798 = vmatpush.msrb.mxu1 %v2601_v18 }
 0x40c   :  { %2878 = vmatpush.msrb.mxu3 %v4584_v41  ;;  %2829 = vmatpush.msrb.mxu2 %v2644_v31 }
 0x40d   :  { %2751 = vmatpush.msrb.mxu0 %v4699_v51 }
 0x40e   :  { %2880 = vmatpush.msrb.mxu3 %v4586_v4  ;;  %2833 = vmatpush.msrb.mxu2 %v2650_v2 }
 0x40f   :  { %2754 = vmatpush.msrb.mxu0 %v4710_v39 }
 0x410   :  { %2882 = vmatpush.msrb.mxu3 %v4588_v30  ;;  %2837 = vmatpush.msrb.mxu2 %v2656_v26 }
 0x411   :  { %2757 = vmatpush.msrb.mxu0 %v4719_v45 }
 0x412   :  { %2884 = vmatpush.msrb.mxu3 %v4590_v62  ;;  %2841 = vmatpush.msrb.mxu2 %v2662_v61 }
 0x413   :  { %2760 = vmatpush.msrb.mxu0 %v2703_v8 }
 0x414   :  { %2886 = vmatpush.msrb.mxu3 %v4592_v33  ;;  %2845 = vmatpush.msrb.mxu2 %v2668_v38 }
 0x416   :  { %2888 = vmatpush.msrb.mxu3 %v4604_v58  ;;  %2849 = vmatpush.msrb.mxu2 %v2674_v60 }
 0x418   :  { %2890 = vmatpush.msrb.mxu3 %v4638_v46  ;;  %2853 = vmatpush.msrb.mxu2 %v2680_v36 }
 0x41a   :  { %2892 = vmatpush.msrb.mxu3 %v4649_v12  ;;  %2857 = vmatpush.msrb.mxu2 %v2686_v21 }
 0x41c   :  { %2894 = vmatpush.msrb.mxu3 %v4651_v20  ;;  %2861 = vmatpush.msrb.mxu2 %v2692_v9 }
 0x41e   :  { %2896 = vmatpush.msrb.mxu3 %v4656_v40  ;;  %2865 = vmatpush.msrb.mxu2 %v2698_v5 }
 0x420   :  { %2898 = vmatpush.msrb.mxu3 %v4666_v49  ;;  %2869 = vmatpush.msrb.mxu2 %v2704_v34 }
 0x422   :  { %2900 = vmatpush.msrb.mxu3 %v4678_v56 }
 0x424   :  { %2902 = vmatpush.msrb.mxu3 %v4690_v24 }
 0x426   :  { %2904 = vmatpush.msrb.mxu3 %v4701_v29 }
 0x428   :  { %2906 = vmatpush.msrb.mxu3 %v2601_v18 }
 0x469   :  { %v2351_v15 = vpop.f32.mrf.mxu1 }
 0x471   :  { %v2250_v41 = vpop.f32.mrf.mxu0  ;;  %v2405_v30 = vpop.f32.mrf.mxu2 }
 0x472   :  { %v2352_v4 = vadd.f32 %v2351_v15, %v2250_v41  ;;  %v2550_v58 = vpop.f32.mrf.mxu1 }
 0x473   :  { %v2444_v33 = vpop.f32.mrf.mxu3 }
 0x474   :  { %v2406_v62 = vadd.f32 %v2405_v30, %v2352_v4 }
 0x476   :  { %v2445_v0 = vadd.f32 %v2444_v33, %v2406_v62 }
 0x479   :  { %v2513_v35 = vpop.f32.mrf.mxu0 }
 0x47a   :  { %v2514_v3 = vadd.f32 %v2513_v35, %v2445_v0 }
 0x47c   :  { %v2551_v37 = vadd.f32 %v2550_v58, %v2514_v3 }
 0x47e   :  { %v2553_v32 = vmax.f32 %v2551_v37, 0.0 }
 0x480   :  { %v2603_v59 = vand.u32 4294901760, %v2553_v32 }
 0x482   :  { %v2604_v55 = vsub.f32 %v2553_v32, %v2603_v59  ;;  %2709 = vmatmul.f32.vlgmr.msra.gmra.mxu3 %v2603_v59 }
 0x484   :  { %2763 = vmatmul.f32.vlgmr.msrb.gmra.mxu0 %v2604_v55  ;;  %v2605_v22 = vand.u32 4294901760, %v2604_v55 }
 0x486   :  { %2802 = vmatmul.f32.vlgmr.msrb.gmra.mxu1 %v2605_v22  ;;  %v2606_v47 = vsub.f32 %v2604_v55, %v2605_v22 }
 0x488   :  { %v2607_v17 = vand.u32 4294901760, %v2606_v47 }
 0x48a   :  { %2608 = vmatmul.f32.vlgmr.msra.gmra.mxu2 %v2607_v17  ;;  %2908 = vmatmul.f32.vlgmr.msrb.gmra.mxu3 %v2603_v59 }
 0x492   :  { %2871 = vmatmul.f32.vlgmr.msrb.gmra.mxu2 %v2603_v59 }
 0x501   :  { %v2764_v46 = vpop.f32.mrf.mxu0 }
 0x503   :  { %v2803_v50 = vpop.f32.mrf.mxu1 }
 0x505   :  { %v2710_v1 = vpop.f32.mrf.mxu3 }
 0x50d   :  { %v2609_v42 = vpop.f32.mrf.mxu2  ;;  %v2909_v26 = vpop.f32.mrf.mxu3 }
 0x50e   :  { %v2711_v31 = vadd.f32 %v2710_v1, %v2609_v42 }
 0x510   :  { %v2765_v2 = vadd.f32 %v2764_v46, %v2711_v31 }
 0x512   :  { %v2804_v12 = vadd.f32 %v2803_v50, %v2765_v2 }
 0x515   :  { %v2872_v20 = vpop.f32.mrf.mxu2 }
 0x516   :  { %v2873_v40 = vadd.f32 %v2872_v20, %v2804_v12 }
 0x518   :  { %v2910_v23 = vadd.f32 %v2909_v26, %v2873_v40 }
 0x51a   :  { %v2912_v19 = vsel %vm387_vm0, %v4116_v48, %v2910_v23 }
 0x51b   :  { %v2913_v49 = vsel %vm1106_vm1, %v4184_v53, %v2912_v19 }
 0x51c   :  { %2914 = vst [vmem:[%s4824_s2] sm:$0xff] %v2913_v49 }
 0x51d   :  { %2919 = vsyncpa [#allocation3], 1 }

</bundles_post_ra>
